<compile_context>
chip_gen: v5e
topology: v5e:2x2
jax: 0.10.0
libtpu: 0.0.40
codegen_flags: <defaults>
</compile_context>

<pallas_src>
import jax
import jax.numpy as jnp
from jax.experimental import pallas as pl
from jax.experimental.pallas import tpu as pltpu


def _permute_kernel(x_ref, o_ref):
    # x_ref: (S, Hs*D)  lane-dense slab holding Hs heads of one batch element.
    # o_ref: (Hs, S, D) head-major output slab.
    hs, _, d = o_ref.shape
    for h in range(hs):  # static unroll; Hs is small (6 here)
        o_ref[h, :, :] = x_ref[:, h * d:(h + 1) * d]


def permute_0213(x, *, head_splits=2):
    """Equivalent of torch.permute(x, (0, 2, 1, 3)) for a (B, S, H, D) array."""
    B, S, H, D = x.shape

    # Fall back to a single head block if splitting would violate the
    # 128-lane divisibility rule on the input block's trailing dim.
    if (head_splits < 1 or head_splits > H or H % head_splits != 0
            or ((H // head_splits) * D) % 128 != 0):
        head_splits = 1
    Hs = H // head_splits

    # Free, contiguous reshape: heads become part of a lane-dense trailing dim,
    # so the input DMA per grid step is one large (row-strided, 1.5 KiB-chunk
    # or fully contiguous) transfer instead of 256 B gathers.
    x_flat = x.reshape(B, S, H * D)

    return pl.pallas_call(
        _permute_kernel,
        out_shape=jax.ShapeDtypeStruct((B, H, S, D), x.dtype),
        grid=(B, head_splits),
        in_specs=[
            pl.BlockSpec(
                (None, S, Hs * D),          # batch dim squeezed out of the kernel view
                lambda b, j: (b, 0, j),
            )
        ],
        out_specs=pl.BlockSpec(
            (None, Hs, S, D),               # batch dim squeezed out of the kernel view
            lambda b, j: (b, j, 0, 0),
        ),
        compiler_params=pltpu.CompilerParams(
            dimension_semantics=("parallel", "parallel"),
        ),
    )(x_flat)


if __name__ == "__main__":
    # Shape implied by the module: x231 = torch.randn([1, 384, 12, 64])
    key = jax.random.PRNGKey(0)
    x231 = jax.random.normal(key, (1, 384, 12, 64), dtype=jnp.float32)

    x232 = permute_0213(x231)
    jax.block_until_ready(x232)

    # Correctness check vs. plain JAX transpose (same semantics as torch.permute).
    ref = jnp.transpose(x231, (0, 2, 1, 3))
    assert x232.shape == (1, 12, 384, 64), x232.shape
    assert x232.dtype == x231.dtype
    assert bool(jnp.array_equal(x232, ref))

    print("KERNEL_OK")
</pallas_src>

<mosaic_0001>
module attributes {stable_mosaic.version = 11 : i64} {
  func.func @_permute_kernel(%arg0: i32, %arg1: i32, %arg2: memref<1x384x384xf32, #tpu.memory_space<vmem>>, %arg3: memref<1x6x384x64xf32, #tpu.memory_space<vmem>>) attributes {dimension_semantics = [#tpu.dimension_semantics<parallel>, #tpu.dimension_semantics<parallel>], iteration_bounds = array<i64: 1, 2>, scalar_prefetch = 0 : i64, scratch_operands = 0 : i64, tpu.core_type = #tpu.core_type<tc>, window_params = [{transform_indices = @transform_0, window_bounds = array<i64: 1, 384, 384>}, {transform_indices = @transform_1, window_bounds = array<i64: 1, 6, 384, 64>}]} {
    %c0 = arith.constant 0 : index
    %c0_0 = arith.constant 0 : index
    %c0_1 = arith.constant 0 : index
    %0 = vector.load %arg2[%c0, %c0_0, %c0_1] : memref<1x384x384xf32, #tpu.memory_space<vmem>>, vector<1x384x64xf32>
    %1 = vector.shape_cast %0 : vector<1x384x64xf32> to vector<384x64xf32>
    %c0_2 = arith.constant 0 : index
    %c0_3 = arith.constant 0 : index
    %c0_4 = arith.constant 0 : index
    %c0_5 = arith.constant 0 : index
    %2 = vector.load %arg3[%c0_2, %c0_3, %c0_4, %c0_5] : memref<1x6x384x64xf32, #tpu.memory_space<vmem>>, vector<1x1x384x64xf32>
    %3 = vector.shape_cast %2 : vector<1x1x384x64xf32> to vector<384x64xf32>
    %4 = vector.shape_cast %1 : vector<384x64xf32> to vector<1x1x384x64xf32>
    tpu.vector_store %arg3[%c0_2, %c0_3, %c0_4, %c0_5], %4 {strides = array<i32>} : memref<1x6x384x64xf32, #tpu.memory_space<vmem>>, vector<1x1x384x64xf32>,
    %c0_6 = arith.constant 0 : index
    %c0_7 = arith.constant 0 : index
    %c64 = arith.constant 64 : index
    %5 = vector.load %arg2[%c0_6, %c0_7, %c64] : memref<1x384x384xf32, #tpu.memory_space<vmem>>, vector<1x384x64xf32>
    %6 = vector.shape_cast %5 : vector<1x384x64xf32> to vector<384x64xf32>
    %c0_8 = arith.constant 0 : index
    %c1 = arith.constant 1 : index
    %c0_9 = arith.constant 0 : index
    %c0_10 = arith.constant 0 : index
    %7 = vector.load %arg3[%c0_8, %c1, %c0_9, %c0_10] : memref<1x6x384x64xf32, #tpu.memory_space<vmem>>, vector<1x1x384x64xf32>
    %8 = vector.shape_cast %7 : vector<1x1x384x64xf32> to vector<384x64xf32>
    %9 = vector.shape_cast %6 : vector<384x64xf32> to vector<1x1x384x64xf32>
    tpu.vector_store %arg3[%c0_8, %c1, %c0_9, %c0_10], %9 {strides = array<i32>} : memref<1x6x384x64xf32, #tpu.memory_space<vmem>>, vector<1x1x384x64xf32>,
    %c0_11 = arith.constant 0 : index
    %c0_12 = arith.constant 0 : index
    %c128 = arith.constant 128 : index
    %10 = vector.load %arg2[%c0_11, %c0_12, %c128] : memref<1x384x384xf32, #tpu.memory_space<vmem>>, vector<1x384x64xf32>
    %11 = vector.shape_cast %10 : vector<1x384x64xf32> to vector<384x64xf32>
    %c0_13 = arith.constant 0 : index
    %c2 = arith.constant 2 : index
    %c0_14 = arith.constant 0 : index
    %c0_15 = arith.constant 0 : index
    %12 = vector.load %arg3[%c0_13, %c2, %c0_14, %c0_15] : memref<1x6x384x64xf32, #tpu.memory_space<vmem>>, vector<1x1x384x64xf32>
    %13 = vector.shape_cast %12 : vector<1x1x384x64xf32> to vector<384x64xf32>
    %14 = vector.shape_cast %11 : vector<384x64xf32> to vector<1x1x384x64xf32>
    tpu.vector_store %arg3[%c0_13, %c2, %c0_14, %c0_15], %14 {strides = array<i32>} : memref<1x6x384x64xf32, #tpu.memory_space<vmem>>, vector<1x1x384x64xf32>,
    %c0_16 = arith.constant 0 : index
    %c0_17 = arith.constant 0 : index
    %c192 = arith.constant 192 : index
    %15 = vector.load %arg2[%c0_16, %c0_17, %c192] : memref<1x384x384xf32, #tpu.memory_space<vmem>>, vector<1x384x64xf32>
    %16 = vector.shape_cast %15 : vector<1x384x64xf32> to vector<384x64xf32>
    %c0_18 = arith.constant 0 : index
    %c3 = arith.constant 3 : index
    %c0_19 = arith.constant 0 : index
    %c0_20 = arith.constant 0 : index
    %17 = vector.load %arg3[%c0_18, %c3, %c0_19, %c0_20] : memref<1x6x384x64xf32, #tpu.memory_space<vmem>>, vector<1x1x384x64xf32>
    %18 = vector.shape_cast %17 : vector<1x1x384x64xf32> to vector<384x64xf32>
    %19 = vector.shape_cast %16 : vector<384x64xf32> to vector<1x1x384x64xf32>
    tpu.vector_store %arg3[%c0_18, %c3, %c0_19, %c0_20], %19 {strides = array<i32>} : memref<1x6x384x64xf32, #tpu.memory_space<vmem>>, vector<1x1x384x64xf32>,
    %c0_21 = arith.constant 0 : index
    %c0_22 = arith.constant 0 : index
    %c256 = arith.constant 256 : index
    %20 = vector.load %arg2[%c0_21, %c0_22, %c256] : memref<1x384x384xf32, #tpu.memory_space<vmem>>, vector<1x384x64xf32>
    %21 = vector.shape_cast %20 : vector<1x384x64xf32> to vector<384x64xf32>
    %c0_23 = arith.constant 0 : index
    %c4 = arith.constant 4 : index
    %c0_24 = arith.constant 0 : index
    %c0_25 = arith.constant 0 : index
    %22 = vector.load %arg3[%c0_23, %c4, %c0_24, %c0_25] : memref<1x6x384x64xf32, #tpu.memory_space<vmem>>, vector<1x1x384x64xf32>
    %23 = vector.shape_cast %22 : vector<1x1x384x64xf32> to vector<384x64xf32>
    %24 = vector.shape_cast %21 : vector<384x64xf32> to vector<1x1x384x64xf32>
    tpu.vector_store %arg3[%c0_23, %c4, %c0_24, %c0_25], %24 {strides = array<i32>} : memref<1x6x384x64xf32, #tpu.memory_space<vmem>>, vector<1x1x384x64xf32>,
    %c0_26 = arith.constant 0 : index
    %c0_27 = arith.constant 0 : index
    %c320 = arith.constant 320 : index
    %25 = vector.load %arg2[%c0_26, %c0_27, %c320] : memref<1x384x384xf32, #tpu.memory_space<vmem>>, vector<1x384x64xf32>
    %26 = vector.shape_cast %25 : vector<1x384x64xf32> to vector<384x64xf32>
    %c0_28 = arith.constant 0 : index
    %c5 = arith.constant 5 : index
    %c0_29 = arith.constant 0 : index
    %c0_30 = arith.constant 0 : index
    %27 = vector.load %arg3[%c0_28, %c5, %c0_29, %c0_30] : memref<1x6x384x64xf32, #tpu.memory_space<vmem>>, vector<1x1x384x64xf32>
    %28 = vector.shape_cast %27 : vector<1x1x384x64xf32> to vector<384x64xf32>
    %29 = vector.shape_cast %26 : vector<384x64xf32> to vector<1x1x384x64xf32>
    tpu.vector_store %arg3[%c0_28, %c5, %c0_29, %c0_30], %29 {strides = array<i32>} : memref<1x6x384x64xf32, #tpu.memory_space<vmem>>, vector<1x1x384x64xf32>,
    return
  }
  func.func @transform_0(%arg0: i32, %arg1: i32) -> (i32, i32, i32) {
    %c0_i32 = arith.constant 0 : i32
    %c0_i32_0 = arith.constant 0 : i32
    return %arg0, %c0_i32, %arg1 : i32, i32, i32
  }
  func.func @transform_1(%arg0: i32, %arg1: i32) -> (i32, i32, i32, i32) {
    %c0_i32 = arith.constant 0 : i32
    %c0_i32_0 = arith.constant 0 : i32
    %c0_i32_1 = arith.constant 0 : i32
    return %arg0, %arg1, %c0_i32, %c0_i32_0 : i32, i32, i32, i32
  }
}

</mosaic_0001>

<bundles_post_ra>
// kernel: tpu_custom_call.1
= control target key start
LH: loop header
LB: loop body
LE: loop exit
PB: predicated region body
PF: predicated region fallthrough
CT: control target
= control target key end

     0   :  { %6 = vsyncpa [#allocation3], 0  ;;  %s3315_s0 = inlined_call_operand.hbm [shape: f32[1,384,768], index: 0, kind: input, shape index: {}]   ;;  %s3316_s1 = inlined_call_operand.vmem [shape: f32[1,12,384,64], index: 1, kind: output, shape index: {}]  }
   0x1   :  { %8 = vsyncpa [#allocation3 + $0x1], 0  ;;  %s1836_s6 = smov 0   ;;  %s1838_s7 = smov 0  }
   0x2   :  { %s1840_s8 = smov 0   ;;  %s1842_s9 = smov 0  }
   0x3   :  { %s1844_s10 = smov 0   ;;  %s1846_s11 = smov 0  }
   0x4 LB: > { %s1428_s12 = sadd.s32 4294967295, %s1820_s11   ;;  %s23_s13 = sadd.s32 1, %s1816_s10  ;;  %s1820_s11 = sphi %s1846_s11, %s14_s11   ;;  %s1816_s10 = sphi %s1844_s10, %s3457_s10   ;;  %s1812_s9 = sphi %s1842_s9, %s3456_s9   ;;  %s1808_s8 = sphi %s1840_s8, %s3455_s8   ;;  %s1804_s7 = sphi %s1838_s7, %s3454_s7   ;;  %s1800_s6 = sphi %s1836_s6, %s3453_s6  }
   0x5   : > { %p24_p0 = scmp.ge.s32.totalorder %s23_s13, 2  ;;  %s35_s14 = sadd.s32 1, %s1808_s8 }
   0x6   : > { %p42_p1 = scmp.ne.s32.totalorder %s1808_s8, %s1804_s7  ;;  %p43_p2 = scmp.eq.s32.totalorder %s1820_s11, 0 }
   0x7   : > { %s3459_s13 = smov (%p24_p0, %s23_s13), 0  ;;  %p48_p4 = scmp.ne.s32.totalorder %s1804_s7, %s1800_s6 }
   0x8   : > { %p44_p3 = por %p43_p2, %p42_p1  ;;  %s31_s15 = ssub.s32 %s1816_s10, %s3459_s13 }
   0x9   : > { %p49_p5 = scmp.eq.s32.totalorder %s1428_s12, 0  ;;  %p33_p6 = scmp.eq.s32.totalorder %s31_s15, 0 }
   0xa   : > { %p1687_p8 = scmp.lt.s32.totalorder %s1820_s11, 2  ;;  %s100_s18 = sand.u32 1, %s1808_s8  }
   0xb   : > { %p1875_p7 = por %p49_p5, %p48_p4  ;;  %s1677_s19 = smul.u32 24, %s1816_s10 }
   0xc   : > { %s1881_s17 = scalar_select %p33_p6, %s1808_s8, %s35_s14  }
   0xd   : > { %s1678_s20 = smul.u32 1152, %s100_s18  ;;  %s111_s23 = scalar_lea.hbm %s3315_s0, %s1677_s19 }
   0xe   : > { %p1684_p9 = pnand %p1687_p8, %p44_p3  ;;  %s112_s24 = sshll.u32 %s111_s23, 4  ;;  %s113_s24 = int_to_ptr.hbm [resolvable:$true] %s112_s24 }
   0xf   : > { %s104_s25 = scalar_lea.vmem [#allocation2], %s1678_s20  ;;  %p1433_p10 = scmp.ge.s32.totalorder %s1820_s11, 1 }
  0x10   : > { %s114_s26 = sshll.u32 %s104_s25, 4  ;;  %s101_s27 = scalar_lea.sflag [#allocation3], %s100_s18  ;;  %s115_s26 = int_to_ptr.vmem [resolvable:$true] %s114_s26 }
  0x11   : > { %s1822_s28 = smov 768   ;;  %s1823_s29 = smov 384  }
  0x12   : > { %s1824_s30 = smov 24   ;;  %p122_p11 = scmp.lt.s32.totalorder %s1820_s11, 3 }
  0x13   : > { %1686 = dma.hbm_to_vmem [thread:$0]  (!%p1684_p9), %s113_s24, 18432, %s115_s26, %s101_s27, %s1822_s28, %s1823_s29, %s1824_s30  }
  0x14   : > { %p123_p12 = pnand %p1433_p10, %p122_p11 }
  0x16   : > { %126 = sbr.rel (%p123_p12) target bundleno = 593 (0x251), region = 24 }
  0x1b   : > { %s128_s2 = sand.u32 1, %s1804_s7  }
  0x1c   : > { %s1679_s3 = smul.u32 1152, %s128_s2  ;;  %s129_s4 = scalar_lea.sflag [#allocation3], %s128_s2 }
  0x1e   : > { %s1891_s5 = scalar_lea.vmem [#allocation2], %s1679_s3 }
  0x1f   : > { %1795 = dma.done.wait (%p1875_p7), %s129_s4, 18432  }
  0x20   : > { %1797 = vsyncadd (%p1875_p7), %s129_s4, 4294948864  ;;  %s158_s6 = smul.u32 6, %s1812_s9  ;;  %v171_v0 = vld [vmem:[%s1891_s5 + $0x30] sm:$0xff]  ;;  %v169_v1 = vld [vmem:[%s1891_s5] sm:$0xff]  ;;  %vm217_vm0 = vcmask 523264   ;;  %s1825_s9 = smov 64  }
  0x21   : > { %366 = vrot.lane.b32.xlu1 %v171_v0, %s1825_s9  ;;  %v1907_v2 = vld [vmem:[%s1891_s5 + $0x18] sm:$0xff]  ;;  %v172_v3 = vld [vmem:[%s1891_s5 + $0x48] sm:$0xff]  ;;  %v1918_v4 = vld [vmem:[%s1891_s5 + $0x60] sm:$0xff] }
  0x22   : > { %p161_p13 = scmp.lt.s32.totalorder %s158_s6, 11  ;;  %v1923_v5 = vld [vmem:[%s1891_s5 + $0x78] sm:$0xff]  ;;  %v1929_v6 = vld [vmem:[%s1891_s5 + $0x90] sm:$0xff]  ;;  %v176_v7 = vld [vmem:[%s1891_s5 + $0xa8] sm:$0xff]  ;;  %362 = vrot.lane.b32.xlu0 %v169_v1, %s1825_s9 }
  0x23   : > { %v1939_v8 = vld [vmem:[%s1891_s5 + $0xc0] sm:$0xff]  ;;  %v1944_v9 = vld [vmem:[%s1891_s5 + $0xd8] sm:$0xff]  ;;  %v1950_v10 = vld [vmem:[%s1891_s5 + $0xf0] sm:$0xff]  ;;  %370 = vrot.lane.b32.xlu2 %v1918_v4, %s1825_s9 }
  0x24   : > { %s3461_s6 = smov (!%p161_p13, %s158_s6), 11  ;;  %v1956_v11 = vld [vmem:[%s1891_s5 + $0x108] sm:$0xff]  ;;  %v1962_v12 = vld [vmem:[%s1891_s5 + $0x120] sm:$0xff]  ;;  %v1968_v13 = vld [vmem:[%s1891_s5 + $0x138] sm:$0xff] }
  0x25   : > { %s1680_s12 = smul.u32 384, %s3461_s6  ;;  %v1974_v14 = vld [vmem:[%s1891_s5 + $0x150] sm:$0xff]  ;;  %v1980_v15 = vld [vmem:[%s1891_s5 + $0x168] sm:$0xff]  ;;  %v1988_v16 = vld [vmem:[%s1891_s5 + $0x180] sm:$0xff] }
  0x26   : > { %v1994_v17 = vld [vmem:[%s1891_s5 + $0x198] sm:$0xff]  ;;  %v2000_v18 = vld [vmem:[%s1891_s5 + $0x1b0] sm:$0xff]  ;;  %v2006_v19 = vld [vmem:[%s1891_s5 + $0x1c8] sm:$0xff] }
  0x27   : > { %s1902_s18 = scalar_lea.vmem %s3316_s1, %s1680_s12  ;;  %v2012_v20 = vld [vmem:[%s1891_s5 + $0x1e0] sm:$0xff]  ;;  %v2018_v21 = vld [vmem:[%s1891_s5 + $0x1f8] sm:$0xff]  ;;  %v2024_v22 = vld [vmem:[%s1891_s5 + $0x210] sm:$0xff] }
  0x28   : > { %218 = vst.msk [vmem:[%s1902_s18] sm:$0xff] %vm217_vm0, %v169_v1  ;;  %v2030_v23 = vld [vmem:[%s1891_s5 + $0x228] sm:$0xff]  ;;  %v2036_v24 = vld [vmem:[%s1891_s5 + $0x240] sm:$0xff]  ;;  %v2042_v25 = vld [vmem:[%s1891_s5 + $0x258] sm:$0xff] }
  0x29   : > { %219 = vst.msk [vmem:[%s1902_s18 + $0x8] sm:$0xff] %vm217_vm0, %v1907_v2  ;;  %368 = vrot.lane.b32.xlu1 %v172_v3, %s1825_s9  ;;  %v2048_v26 = vld [vmem:[%s1891_s5 + $0x270] sm:$0xff]  ;;  %v2054_v27 = vld [vmem:[%s1891_s5 + $0x288] sm:$0xff] }
  0x2a   : > { %220 = vst.msk [vmem:[%s1902_s18 + $0x10] sm:$0xff] %vm217_vm0, %v171_v0  ;;  %v2060_v28 = vld [vmem:[%s1891_s5 + $0x2a0] sm:$0xff]  ;;  %v2066_v29 = vld [vmem:[%s1891_s5 + $0x2b8] sm:$0xff]  ;;  %v2072_v30 = vld [vmem:[%s1891_s5 + $0x2d0] sm:$0xff] }
  0x2b   : > { %221 = vst.msk [vmem:[%s1902_s18 + $0x18] sm:$0xff] %vm217_vm0, %v172_v3  ;;  %v2078_v31 = vld [vmem:[%s1891_s5 + $0x2e8] sm:$0xff]  ;;  %v2084_v32 = vld [vmem:[%s1891_s5 + $0x300] sm:$0xff]  ;;  %364 = vrot.lane.b32.xlu0 %v1907_v2, %s1825_s9 }
  0x2c   : > { %222 = vst.msk [vmem:[%s1902_s18 + $0x20] sm:$0xff] %vm217_vm0, %v1918_v4  ;;  %v2093_v33 = vld [vmem:[%s1891_s5 + $0x318] sm:$0xff]  ;;  %v2101_v34 = vld [vmem:[%s1891_s5 + $0x330] sm:$0xff]  ;;  %v2107_v35 = vld [vmem:[%s1891_s5 + $0x348] sm:$0xff] }
  0x2d   : > { %223 = vst.msk [vmem:[%s1902_s18 + $0x28] sm:$0xff] %vm217_vm0, %v1923_v5  ;;  %v2113_v36 = vld [vmem:[%s1891_s5 + $0x360] sm:$0xff]  ;;  %v2119_v37 = vld [vmem:[%s1891_s5 + $0x378] sm:$0xff]  ;;  %v2125_v38 = vld [vmem:[%s1891_s5 + $0x390] sm:$0xff] }
  0x2e   : > { %224 = vst.msk [vmem:[%s1902_s18 + $0x30] sm:$0xff] %vm217_vm0, %v1929_v6  ;;  %v2131_v39 = vld [vmem:[%s1891_s5 + $0x3a8] sm:$0xff]  ;;  %v2137_v40 = vld [vmem:[%s1891_s5 + $0x3c0] sm:$0xff]  ;;  %v2147_v41 = vld [vmem:[%s1891_s5 + $0x3d8] sm:$0xff] }
  0x2f   : > { %225 = vst.msk [vmem:[%s1902_s18 + $0x38] sm:$0xff] %vm217_vm0, %v176_v7  ;;  %372 = vrot.lane.b32.xlu2 %v1923_v5, %s1825_s9  ;;  %v2155_v42 = vld [vmem:[%s1891_s5 + $0x3f0] sm:$0xff]  ;;  %v2161_v43 = vld [vmem:[%s1891_s5 + $0x408] sm:$0xff] }
  0x30   : > { %226 = vst.msk [vmem:[%s1902_s18 + $0x40] sm:$0xff] %vm217_vm0, %v1939_v8  ;;  %v2167_v44 = vld [vmem:[%s1891_s5 + $0x420] sm:$0xff]  ;;  %v2173_v45 = vld [vmem:[%s1891_s5 + $0x438] sm:$0xff]  ;;  %v2179_v46 = vld [vmem:[%s1891_s5 + $0x450] sm:$0xff] }
  0x31   : > { %227 = vst.msk [vmem:[%s1902_s18 + $0x48] sm:$0xff] %vm217_vm0, %v1944_v9  ;;  %376 = vrot.lane.b32.xlu1 %v176_v7, %s1825_s9  ;;  %v2185_v47 = vld [vmem:[%s1891_s5 + $0x468] sm:$0xff]  ;;  %v2201_v49 = vld [vmem:[%s1891_s5 + $0x20] sm:$0xff] }
  0x32   : > { %228 = vst.msk [vmem:[%s1902_s18 + $0x50] sm:$0xff] %vm217_vm0, %v1950_v10  ;;  %v2194_v48 = vld [vmem:[%s1891_s5 + $0x8] sm:$0xff]  ;;  %v2209_v50 = vld [vmem:[%s1891_s5 + $0x38] sm:$0xff]  ;;  %v2215_v51 = vld [vmem:[%s1891_s5 + $0x50] sm:$0xff] }
  0x33   : > { %229 = vst.msk [vmem:[%s1902_s18 + $0x58] sm:$0xff] %vm217_vm0, %v1956_v11  ;;  %374 = vrot.lane.b32.xlu0 %v1929_v6, %s1825_s9  ;;  %v2221_v52 = vld [vmem:[%s1891_s5 + $0x68] sm:$0xff]  ;;  %v2227_v53 = vld [vmem:[%s1891_s5 + $0x80] sm:$0xff] }
  0x34   : > { %230 = vst.msk [vmem:[%s1902_s18 + $0x60] sm:$0xff] %vm217_vm0, %v1962_v12  ;;  %v2233_v54 = vld [vmem:[%s1891_s5 + $0x98] sm:$0xff]  ;;  %v2239_v55 = vld [vmem:[%s1891_s5 + $0xb0] sm:$0xff]  ;;  %v2245_v56 = vld [vmem:[%s1891_s5 + $0xc8] sm:$0xff] }
  0x35   : > { %231 = vst.msk [vmem:[%s1902_s18 + $0x68] sm:$0xff] %vm217_vm0, %v1968_v13  ;;  %v2255_v57 = vld [vmem:[%s1891_s5 + $0xe0] sm:$0xff]  ;;  %v2263_v58 = vld [vmem:[%s1891_s5 + $0xf8] sm:$0xff]  ;;  %v2269_v59 = vld [vmem:[%s1891_s5 + $0x110] sm:$0xff] }
  0x36   : > { %232 = vst.msk [vmem:[%s1902_s18 + $0x70] sm:$0xff] %vm217_vm0, %v1974_v14  ;;  %v2275_v60 = vld [vmem:[%s1891_s5 + $0x128] sm:$0xff]  ;;  %v2281_v61 = vld [vmem:[%s1891_s5 + $0x140] sm:$0xff]  ;;  %v2287_v62 = vld [vmem:[%s1891_s5 + $0x158] sm:$0xff] }
  0x37   : > { %233 = vst.msk [vmem:[%s1902_s18 + $0x78] sm:$0xff] %vm217_vm0, %v1980_v15  ;;  %378 = vrot.lane.b32.xlu2 %v1939_v8, %s1825_s9  ;;  %v2293_v63 = vld [vmem:[%s1891_s5 + $0x170] sm:$0xff]  ;;  %v2299_v0 = vld [vmem:[%s1891_s5 + $0x188] sm:$0xff] }
  0x38   : > { %234 = vst.msk [vmem:[%s1902_s18 + $0x80] sm:$0xff] %vm217_vm0, %v1988_v16  ;;  %v2305_v1 = vld [vmem:[%s1891_s5 + $0x1a0] sm:$0xff]  ;;  %v2311_v2 = vld [vmem:[%s1891_s5 + $0x1b8] sm:$0xff]  ;;  %v2317_v3 = vld [vmem:[%s1891_s5 + $0x1d0] sm:$0xff] }
  0x39   : > { %235 = vst.msk [vmem:[%s1902_s18 + $0x88] sm:$0xff] %vm217_vm0, %v1994_v17  ;;  %382 = vrot.lane.b32.xlu1 %v1950_v10, %s1825_s9  ;;  %v2323_v4 = vld [vmem:[%s1891_s5 + $0x1e8] sm:$0xff]  ;;  %v2329_v5 = vld [vmem:[%s1891_s5 + $0x200] sm:$0xff] }
  0x3a   : > { %236 = vst.msk [vmem:[%s1902_s18 + $0x90] sm:$0xff] %vm217_vm0, %v2000_v18  ;;  %v2335_v6 = vld [vmem:[%s1891_s5 + $0x218] sm:$0xff]  ;;  %v2341_v7 = vld [vmem:[%s1891_s5 + $0x230] sm:$0xff]  ;;  %v2347_v8 = vld [vmem:[%s1891_s5 + $0x248] sm:$0xff] }
  0x3b   : > { %237 = vst.msk [vmem:[%s1902_s18 + $0x98] sm:$0xff] %vm217_vm0, %v2006_v19  ;;  %380 = vrot.lane.b32.xlu0 %v1944_v9, %s1825_s9  ;;  %v2353_v9 = vld [vmem:[%s1891_s5 + $0x260] sm:$0xff]  ;;  %v2359_v10 = vld [vmem:[%s1891_s5 + $0x278] sm:$0xff] }
  0x3c   : > { %238 = vst.msk [vmem:[%s1902_s18 + $0xa0] sm:$0xff] %vm217_vm0, %v2012_v20 }
  0x3d   : > { %239 = vst.msk [vmem:[%s1902_s18 + $0xa8] sm:$0xff] %vm217_vm0, %v2018_v21 }
  0x3e   : > { %240 = vst.msk [vmem:[%s1902_s18 + $0xb0] sm:$0xff] %vm217_vm0, %v2024_v22 }
  0x3f   : > { %241 = vst.msk [vmem:[%s1902_s18 + $0xb8] sm:$0xff] %vm217_vm0, %v2030_v23  ;;  %384 = vrot.lane.b32.xlu2 %v1956_v11, %s1825_s9  ;;  %v2365_v11 = vld [vmem:[%s1891_s5 + $0x290] sm:$0xff] }
  0x40   : > { %242 = vst.msk [vmem:[%s1902_s18 + $0xc0] sm:$0xff] %vm217_vm0, %v2036_v24 }
  0x41   : > { %243 = vst.msk [vmem:[%s1902_s18 + $0xc8] sm:$0xff] %vm217_vm0, %v2042_v25  ;;  %388 = vrot.lane.b32.xlu1 %v1968_v13, %s1825_s9  ;;  %v2377_v13 = vld [vmem:[%s1891_s5 + $0x2c0] sm:$0xff] }
  0x42   : > { %244 = vst.msk [vmem:[%s1902_s18 + $0xd0] sm:$0xff] %vm217_vm0, %v2048_v26 }
  0x43   : > { %245 = vst.msk [vmem:[%s1902_s18 + $0xd8] sm:$0xff] %vm217_vm0, %v2054_v27  ;;  %386 = vrot.lane.b32.xlu0 %v1962_v12, %s1825_s9  ;;  %v2371_v12 = vld [vmem:[%s1891_s5 + $0x2a8] sm:$0xff] }
  0x44   : > { %246 = vst.msk [vmem:[%s1902_s18 + $0xe0] sm:$0xff] %vm217_vm0, %v2060_v28 }
  0x45   : > { %247 = vst.msk [vmem:[%s1902_s18 + $0xe8] sm:$0xff] %vm217_vm0, %v2066_v29 }
  0x46   : > { %248 = vst.msk [vmem:[%s1902_s18 + $0xf0] sm:$0xff] %vm217_vm0, %v2072_v30 }
  0x47   : > { %249 = vst.msk [vmem:[%s1902_s18 + $0xf8] sm:$0xff] %vm217_vm0, %v2078_v31  ;;  %390 = vrot.lane.b32.xlu2 %v1974_v14, %s1825_s9  ;;  %v2431_v14 = vld [vmem:[%s1891_s5 + $0x380] sm:$0xff] }
  0x48   : > { %250 = vst.msk [vmem:[%s1902_s18 + $0x100] sm:$0xff] %vm217_vm0, %v2084_v32 }
  0x49   : > { %251 = vst.msk [vmem:[%s1902_s18 + $0x108] sm:$0xff] %vm217_vm0, %v2093_v33  ;;  %394 = vrot.lane.b32.xlu1 %v1988_v16, %s1825_s9  ;;  %v2383_v16 = vld [vmem:[%s1891_s5 + $0x2d8] sm:$0xff] }
  0x4a   : > { %252 = vst.msk [vmem:[%s1902_s18 + $0x110] sm:$0xff] %vm217_vm0, %v2101_v34 }
  0x4b   : > { %253 = vst.msk [vmem:[%s1902_s18 + $0x118] sm:$0xff] %vm217_vm0, %v2107_v35  ;;  %392 = vrot.lane.b32.xlu0 %v1980_v15, %s1825_s9  ;;  %v2419_v15 = vld [vmem:[%s1891_s5 + $0x350] sm:$0xff] }
  0x4c   : > { %254 = vst.msk [vmem:[%s1902_s18 + $0x120] sm:$0xff] %vm217_vm0, %v2113_v36 }
  0x4d   : > { %255 = vst.msk [vmem:[%s1902_s18 + $0x128] sm:$0xff] %vm217_vm0, %v2119_v37 }
  0x4e   : > { %256 = vst.msk [vmem:[%s1902_s18 + $0x130] sm:$0xff] %vm217_vm0, %v2125_v38 }
  0x4f   : > { %257 = vst.msk [vmem:[%s1902_s18 + $0x138] sm:$0xff] %vm217_vm0, %v2131_v39  ;;  %396 = vrot.lane.b32.xlu2 %v1994_v17, %s1825_s9  ;;  %v2485_v17 = vld [vmem:[%s1891_s5 + $0x440] sm:$0xff] }
  0x50   : > { %258 = vst.msk [vmem:[%s1902_s18 + $0x140] sm:$0xff] %vm217_vm0, %v2137_v40 }
  0x51   : > { %259 = vst.msk [vmem:[%s1902_s18 + $0x148] sm:$0xff] %vm217_vm0, %v2147_v41  ;;  %400 = vrot.lane.b32.xlu1 %v2006_v19, %s1825_s9  ;;  %v2425_v19 = vld [vmem:[%s1891_s5 + $0x368] sm:$0xff] }
  0x52   : > { %260 = vst.msk [vmem:[%s1902_s18 + $0x150] sm:$0xff] %vm217_vm0, %v2155_v42 }
  0x53   : > { %261 = vst.msk [vmem:[%s1902_s18 + $0x158] sm:$0xff] %vm217_vm0, %v2161_v43  ;;  %398 = vrot.lane.b32.xlu0 %v2000_v18, %s1825_s9  ;;  %v2473_v18 = vld [vmem:[%s1891_s5 + $0x410] sm:$0xff] }
  0x54   : > { %262 = vst.msk [vmem:[%s1902_s18 + $0x160] sm:$0xff] %vm217_vm0, %v2167_v44 }
  0x55   : > { %263 = vst.msk [vmem:[%s1902_s18 + $0x168] sm:$0xff] %vm217_vm0, %v2173_v45 }
  0x56   : > { %264 = vst.msk [vmem:[%s1902_s18 + $0x170] sm:$0xff] %vm217_vm0, %v2179_v46 }
  0x57   : > { %265 = vst.msk [vmem:[%s1902_s18 + $0x178] sm:$0xff] %vm217_vm0, %v2185_v47  ;;  %402 = vrot.lane.b32.xlu2 %v2012_v20, %s1825_s9  ;;  %v2539_v20 = vld [vmem:[%s1891_s5 + $0x88] sm:$0xff] }
  0x58   : > { %1483 = vst.msk [vmem:[%s1902_s18 + $0x300] sm:$0xff] %vm217_vm0, %v2194_v48 }
  0x59   : > { %1484 = vst.msk [vmem:[%s1902_s18 + $0x308] sm:$0xff] %vm217_vm0, %v2201_v49  ;;  %406 = vrot.lane.b32.xlu1 %v2024_v22, %s1825_s9  ;;  %v2479_v22 = vld [vmem:[%s1891_s5 + $0x428] sm:$0xff] }
  0x5a   : > { %1485 = vst.msk [vmem:[%s1902_s18 + $0x310] sm:$0xff] %vm217_vm0, %v2209_v50 }
  0x5b   : > { %1486 = vst.msk [vmem:[%s1902_s18 + $0x318] sm:$0xff] %vm217_vm0, %v2215_v51  ;;  %404 = vrot.lane.b32.xlu0 %v2018_v21, %s1825_s9  ;;  %v2527_v21 = vld [vmem:[%s1891_s5 + $0x58] sm:$0xff] }
  0x5c   : > { %1487 = vst.msk [vmem:[%s1902_s18 + $0x320] sm:$0xff] %vm217_vm0, %v2221_v52 }
  0x5d   : > { %1488 = vst.msk [vmem:[%s1902_s18 + $0x328] sm:$0xff] %vm217_vm0, %v2227_v53 }
  0x5e   : > { %1489 = vst.msk [vmem:[%s1902_s18 + $0x330] sm:$0xff] %vm217_vm0, %v2233_v54 }
  0x5f   : > { %1490 = vst.msk [vmem:[%s1902_s18 + $0x338] sm:$0xff] %vm217_vm0, %v2239_v55  ;;  %408 = vrot.lane.b32.xlu2 %v2030_v23, %s1825_s9  ;;  %v2593_v23 = vld [vmem:[%s1891_s5 + $0x148] sm:$0xff] }
  0x60   : > { %1491 = vst.msk [vmem:[%s1902_s18 + $0x340] sm:$0xff] %vm217_vm0, %v2245_v56 }
  0x61   : > { %1492 = vst.msk [vmem:[%s1902_s18 + $0x348] sm:$0xff] %vm217_vm0, %v2255_v57  ;;  %412 = vrot.lane.b32.xlu1 %v2042_v25, %s1825_s9  ;;  %v2533_v25 = vld [vmem:[%s1891_s5 + $0x70] sm:$0xff] }
  0x62   : > { %1493 = vst.msk [vmem:[%s1902_s18 + $0x350] sm:$0xff] %vm217_vm0, %v2263_v58 }
  0x63   : > { %1494 = vst.msk [vmem:[%s1902_s18 + $0x358] sm:$0xff] %vm217_vm0, %v2269_v59  ;;  %410 = vrot.lane.b32.xlu0 %v2036_v24, %s1825_s9  ;;  %v2581_v24 = vld [vmem:[%s1891_s5 + $0x118] sm:$0xff] }
  0x64   : > { %1495 = vst.msk [vmem:[%s1902_s18 + $0x360] sm:$0xff] %vm217_vm0, %v2275_v60 }
  0x65   : > { %1496 = vst.msk [vmem:[%s1902_s18 + $0x368] sm:$0xff] %vm217_vm0, %v2281_v61 }
  0x66   : > { %1497 = vst.msk [vmem:[%s1902_s18 + $0x370] sm:$0xff] %vm217_vm0, %v2287_v62 }
  0x67   : > { %1498 = vst.msk [vmem:[%s1902_s18 + $0x378] sm:$0xff] %vm217_vm0, %v2293_v63  ;;  %414 = vrot.lane.b32.xlu2 %v2048_v26, %s1825_s9  ;;  %v2647_v26 = vld [vmem:[%s1891_s5 + $0x208] sm:$0xff] }
  0x68   : > { %1499 = vst.msk [vmem:[%s1902_s18 + $0x380] sm:$0xff] %vm217_vm0, %v2299_v0 }
  0x69   : > { %1500 = vst.msk [vmem:[%s1902_s18 + $0x388] sm:$0xff] %vm217_vm0, %v2305_v1  ;;  %418 = vrot.lane.b32.xlu1 %v2060_v28, %s1825_s9  ;;  %v2587_v28 = vld [vmem:[%s1891_s5 + $0x130] sm:$0xff] }
  0x6a   : > { %1501 = vst.msk [vmem:[%s1902_s18 + $0x390] sm:$0xff] %vm217_vm0, %v2311_v2 }
  0x6b   : > { %1502 = vst.msk [vmem:[%s1902_s18 + $0x398] sm:$0xff] %vm217_vm0, %v2317_v3  ;;  %416 = vrot.lane.b32.xlu0 %v2054_v27, %s1825_s9  ;;  %v2635_v27 = vld [vmem:[%s1891_s5 + $0x1d8] sm:$0xff] }
  0x6c   : > { %1503 = vst.msk [vmem:[%s1902_s18 + $0x3a0] sm:$0xff] %vm217_vm0, %v2323_v4 }
  0x6d   : > { %1504 = vst.msk [vmem:[%s1902_s18 + $0x3a8] sm:$0xff] %vm217_vm0, %v2329_v5 }
  0x6e   : > { %1505 = vst.msk [vmem:[%s1902_s18 + $0x3b0] sm:$0xff] %vm217_vm0, %v2335_v6 }
  0x6f   : > { %1506 = vst.msk [vmem:[%s1902_s18 + $0x3b8] sm:$0xff] %vm217_vm0, %v2341_v7  ;;  %420 = vrot.lane.b32.xlu2 %v2066_v29, %s1825_s9  ;;  %v2701_v29 = vld [vmem:[%s1891_s5 + $0x2c8] sm:$0xff] }
  0x70   : > { %1507 = vst.msk [vmem:[%s1902_s18 + $0x3c0] sm:$0xff] %vm217_vm0, %v2347_v8 }
  0x71   : > { %3363 = vst [vmem:[#allocation5_spill] sm:$0xff] %v2359_v10  ;;  %424 = vrot.lane.b32.xlu1 %v2078_v31, %s1825_s9  ;;  %v2641_v31 = vld [vmem:[%s1891_s5 + $0x1f0] sm:$0xff] }
  0x72   : > { %1508 = vst.msk [vmem:[%s1902_s18 + $0x3c8] sm:$0xff] %vm217_vm0, %v2353_v9 }
  0x73   : > { %3364 = vst [vmem:[#allocation6_spill] sm:$0xff] %v2365_v11  ;;  %422 = vrot.lane.b32.xlu0 %v2072_v30, %s1825_s9  ;;  %v2689_v30 = vld [vmem:[%s1891_s5 + $0x298] sm:$0xff] }
  0x74   : > { %1509 = vst.msk [vmem:[%s1902_s18 + $0x3d0] sm:$0xff] %vm217_vm0, %v2359_v10  ;;  %v2389_v10 = vld [vmem:[%s1891_s5 + $0x2f0] sm:$0xff] }
  0x75   : > { %1510 = vst.msk [vmem:[%s1902_s18 + $0x3d8] sm:$0xff] %vm217_vm0, %v2365_v11  ;;  %v2395_v11 = vld [vmem:[%s1891_s5 + $0x308] sm:$0xff] }
  0x76   : > { %3365 = vst [vmem:[#allocation7_spill] sm:$0xff] %v2377_v13 }
  0x77   : > { %1511 = vst.msk [vmem:[%s1902_s18 + $0x3e0] sm:$0xff] %vm217_vm0, %v2371_v12  ;;  %426 = vrot.lane.b32.xlu2 %v2084_v32, %s1825_s9  ;;  %v2759_v32 = vld [vmem:[%s1891_s5 + $0x3b8] sm:$0xff] }
  0x78   : > { %3366 = vst [vmem:[#allocation8_spill] sm:$0xff] %v2383_v16 }
  0x79   : > { %1512 = vst.msk [vmem:[%s1902_s18 + $0x3e8] sm:$0xff] %vm217_vm0, %v2377_v13  ;;  %v2405_v13 = vld [vmem:[%s1891_s5 + $0x320] sm:$0xff]  ;;  %430 = vrot.lane.b32.xlu1 %v2101_v34, %s1825_s9 }
  0x7a   : > { %1513 = vst.msk [vmem:[%s1902_s18 + $0x3f0] sm:$0xff] %vm217_vm0, %v2383_v16  ;;  %v2413_v16 = vld [vmem:[%s1891_s5 + $0x338] sm:$0xff] }
  0x7b   : > { %3367 = vst [vmem:[#allocation9_spill] sm:$0xff] %v2395_v11  ;;  %428 = vrot.lane.b32.xlu0 %v2093_v33, %s1825_s9 }
  0x7c   : > { %1514 = vst.msk [vmem:[%s1902_s18 + $0x3f8] sm:$0xff] %vm217_vm0, %v2389_v10 }
  0x7d   : > { %3368 = vst [vmem:[#allocation10_spill] sm:$0xff] %v2405_v13  ;;  %v371_v34 = vpop.permute.xlu2 %370 }
  0x7e   : > { %1515 = vst.msk [vmem:[%s1902_s18 + $0x400] sm:$0xff] %vm217_vm0, %v2395_v11  ;;  %v2437_v11 = vld [vmem:[%s1891_s5 + $0x398] sm:$0xff] }
  0x7f   : > { %1516 = vst.msk [vmem:[%s1902_s18 + $0x408] sm:$0xff] %vm217_vm0, %v2405_v13  ;;  %v2443_v13 = vld [vmem:[%s1891_s5 + $0x3b0] sm:$0xff]  ;;  %432 = vrot.lane.b32.xlu2 %v2107_v35, %s1825_s9 }
  0x80   : > { %3369 = vst [vmem:[#allocation11_spill] sm:$0xff] %v2419_v15 }
  0x81   : > { %1517 = vst.msk [vmem:[%s1902_s18 + $0x410] sm:$0xff] %vm217_vm0, %v2413_v16  ;;  %436 = vrot.lane.b32.xlu1 %v2119_v37, %s1825_s9  ;;  %v2744_v37 = vld [vmem:[%s1891_s5 + $0x370] sm:$0xff] }
  0x82   : > { %3370 = vst [vmem:[#allocation12_spill] sm:$0xff] %v2425_v19 }
  0x83   : > { %1518 = vst.msk [vmem:[%s1902_s18 + $0x418] sm:$0xff] %vm217_vm0, %v2419_v15  ;;  %v2449_v15 = vld [vmem:[%s1891_s5 + $0x3c8] sm:$0xff]  ;;  %434 = vrot.lane.b32.xlu0 %v2113_v36, %s1825_s9 }
  0x84   : > { %1519 = vst.msk [vmem:[%s1902_s18 + $0x420] sm:$0xff] %vm217_vm0, %v2425_v19  ;;  %v2459_v19 = vld [vmem:[%s1891_s5 + $0x3e0] sm:$0xff]  ;;  %v986_v36 = vld [vmem:[%s1891_s5 + $0x448] sm:$0xff] }
  0x85   : > { %3371 = vst [vmem:[#allocation13_spill] sm:$0xff] %v2437_v11 }
  0x86   : > { %1520 = vst.msk [vmem:[%s1902_s18 + $0x428] sm:$0xff] %vm217_vm0, %v2431_v14 }
  0x87   : > { %1521 = vst.msk [vmem:[%s1902_s18 + $0x430] sm:$0xff] %vm217_vm0, %v2437_v11  ;;  %v2467_v11 = vld [vmem:[%s1891_s5 + $0x3f8] sm:$0xff]  ;;  %438 = vrot.lane.b32.xlu2 %v2125_v38, %s1825_s9 }
  0x88   : > { %1522 = vst.msk [vmem:[%s1902_s18 + $0x438] sm:$0xff] %vm217_vm0, %v2443_v13 }
  0x89   : > { %3372 = vst [vmem:[#allocation14_spill] sm:$0xff] %v2459_v19  ;;  %v373_v33 = vpop.permute.xlu2 %372  ;;  %442 = vrot.lane.b32.xlu1 %v2137_v40, %s1825_s9  ;;  %v987_v40 = vld [vmem:[%s1891_s5 + $0x460] sm:$0xff] }
  0x8a   : > { %1523 = vst.msk [vmem:[%s1902_s18 + $0x440] sm:$0xff] %vm217_vm0, %v2449_v15 }
  0x8b   : > { %3373 = vst [vmem:[#allocation15_spill] sm:$0xff] %v2467_v11  ;;  %440 = vrot.lane.b32.xlu0 %v2131_v39, %s1825_s9 }
  0x8c   : > { %1524 = vst.msk [vmem:[%s1902_s18 + $0x448] sm:$0xff] %vm217_vm0, %v2459_v19  ;;  %v2491_v19 = vld [vmem:[%s1891_s5 + $0x458] sm:$0xff] }
  0x8d   : > { %1525 = vst.msk [vmem:[%s1902_s18 + $0x450] sm:$0xff] %vm217_vm0, %v2467_v11  ;;  %v2497_v11 = vld [vmem:[%s1891_s5 + $0x470] sm:$0xff] }
  0x8e   : > { %3374 = vst [vmem:[#allocation16_spill] sm:$0xff] %v2479_v22 }
  0x8f   : > { %1526 = vst.msk [vmem:[%s1902_s18 + $0x458] sm:$0xff] %vm217_vm0, %v2473_v18  ;;  %444 = vrot.lane.b32.xlu2 %v2147_v41, %s1825_s9 }
  0x90   : > { %3375 = vst [vmem:[#allocation17_spill] sm:$0xff] %v2485_v17 }
  0x91   : > { %1527 = vst.msk [vmem:[%s1902_s18 + $0x460] sm:$0xff] %vm217_vm0, %v2479_v22  ;;  %v2506_v22 = vld [vmem:[%s1891_s5 + $0x10] sm:$0xff]  ;;  %448 = vrot.lane.b32.xlu1 %v2161_v43, %s1825_s9 }
  0x92   : > { %1528 = vst.msk [vmem:[%s1902_s18 + $0x468] sm:$0xff] %vm217_vm0, %v2485_v17  ;;  %v2513_v17 = vld [vmem:[%s1891_s5 + $0x28] sm:$0xff] }
  0x93   : > { %3376 = vst [vmem:[#allocation18_spill] sm:$0xff] %v2497_v11  ;;  %446 = vrot.lane.b32.xlu0 %v2155_v42, %s1825_s9 }
  0x94   : > { %1529 = vst.msk [vmem:[%s1902_s18 + $0x470] sm:$0xff] %vm217_vm0, %v2491_v19 }
  0x95   : > { %1530 = vst.msk [vmem:[%s1902_s18 + $0x478] sm:$0xff] %vm217_vm0, %v2497_v11  ;;  %v2521_v11 = vld [vmem:[%s1891_s5 + $0x40] sm:$0xff] }
  0x96   : > { %3377 = vst [vmem:[#allocation19_spill] sm:$0xff] %v2506_v22 }
  0x97   : > { %1579 = vst.msk [vmem:[%s1902_s18 + $0x600] sm:$0xff] %vm217_vm0, %v2506_v22  ;;  %v2545_v22 = vld [vmem:[%s1891_s5 + $0xa0] sm:$0xff]  ;;  %450 = vrot.lane.b32.xlu2 %v2167_v44, %s1825_s9 }
  0x98   : > { %3378 = vst [vmem:[#allocation20_spill] sm:$0xff] %v2521_v11 }
  0x99   : > { %1580 = vst.msk [vmem:[%s1902_s18 + $0x608] sm:$0xff] %vm217_vm0, %v2513_v17  ;;  %454 = vrot.lane.b32.xlu1 %v2179_v46, %s1825_s9 }
  0x9a   : > { %3379 = vst [vmem:[#allocation21_spill] sm:$0xff] %v2527_v21 }
  0x9b   : > { %1581 = vst.msk [vmem:[%s1902_s18 + $0x610] sm:$0xff] %vm217_vm0, %v2521_v11  ;;  %v2551_v11 = vld [vmem:[%s1891_s5 + $0xb8] sm:$0xff]  ;;  %452 = vrot.lane.b32.xlu0 %v2173_v45, %s1825_s9 }
  0x9c   : > { %1582 = vst.msk [vmem:[%s1902_s18 + $0x618] sm:$0xff] %vm217_vm0, %v2527_v21  ;;  %v2557_v21 = vld [vmem:[%s1891_s5 + $0xd0] sm:$0xff] }
  0x9d   : > { %3380 = vst [vmem:[#allocation22_spill] sm:$0xff] %v2539_v20 }
  0x9e   : > { %1583 = vst.msk [vmem:[%s1902_s18 + $0x620] sm:$0xff] %vm217_vm0, %v2533_v25 }
  0x9f   : > { %3381 = vst [vmem:[#allocation23_spill] sm:$0xff] %v2545_v22  ;;  %456 = vrot.lane.b32.xlu2 %v2185_v47, %s1825_s9 }
  0xa0   : > { %1584 = vst.msk [vmem:[%s1902_s18 + $0x628] sm:$0xff] %vm217_vm0, %v2539_v20  ;;  %v2567_v20 = vld [vmem:[%s1891_s5 + $0xe8] sm:$0xff] }
  0xa1   : > { %1585 = vst.msk [vmem:[%s1902_s18 + $0x630] sm:$0xff] %vm217_vm0, %v2545_v22  ;;  %v2575_v22 = vld [vmem:[%s1891_s5 + $0x100] sm:$0xff]  ;;  %750 = vrot.lane.b32.xlu1 %v2201_v49, %s1825_s9 }
  0xa2   : > { %3382 = vst [vmem:[#allocation24_spill] sm:$0xff] %v2557_v21 }
  0xa3   : > { %1586 = vst.msk [vmem:[%s1902_s18 + $0x638] sm:$0xff] %vm217_vm0, %v2551_v11  ;;  %748 = vrot.lane.b32.xlu0 %v2194_v48, %s1825_s9 }
  0xa4   : > { %3383 = vst [vmem:[#allocation25_spill] sm:$0xff] %v2567_v20 }
  0xa5   : > { %1587 = vst.msk [vmem:[%s1902_s18 + $0x640] sm:$0xff] %vm217_vm0, %v2557_v21  ;;  %v2599_v21 = vld [vmem:[%s1891_s5 + $0x160] sm:$0xff] }
  0xa6   : > { %1588 = vst.msk [vmem:[%s1902_s18 + $0x648] sm:$0xff] %vm217_vm0, %v2567_v20  ;;  %v2605_v20 = vld [vmem:[%s1891_s5 + $0x178] sm:$0xff] }
  0xa7   : > { %3384 = vst [vmem:[#allocation26_spill] sm:$0xff] %v2581_v24  ;;  %752 = vrot.lane.b32.xlu2 %v2209_v50, %s1825_s9 }
  0xa8   : > { %1589 = vst.msk [vmem:[%s1902_s18 + $0x650] sm:$0xff] %vm217_vm0, %v2575_v22 }
  0xa9   : > { %3385 = vst [vmem:[#allocation27_spill] sm:$0xff] %v2587_v28  ;;  %756 = vrot.lane.b32.xlu1 %v2221_v52, %s1825_s9 }
  0xaa   : > { %1590 = vst.msk [vmem:[%s1902_s18 + $0x658] sm:$0xff] %vm217_vm0, %v2581_v24  ;;  %v2611_v24 = vld [vmem:[%s1891_s5 + $0x190] sm:$0xff] }
  0xab   : > { %1591 = vst.msk [vmem:[%s1902_s18 + $0x660] sm:$0xff] %vm217_vm0, %v2587_v28  ;;  %v2621_v28 = vld [vmem:[%s1891_s5 + $0x1a8] sm:$0xff]  ;;  %754 = vrot.lane.b32.xlu0 %v2215_v51, %s1825_s9 }
  0xac   : > { %3386 = vst [vmem:[#allocation28_spill] sm:$0xff] %v2599_v21 }
  0xad   : > { %1592 = vst.msk [vmem:[%s1902_s18 + $0x668] sm:$0xff] %vm217_vm0, %v2593_v23 }
  0xae   : > { %1593 = vst.msk [vmem:[%s1902_s18 + $0x670] sm:$0xff] %vm217_vm0, %v2599_v21  ;;  %v2629_v21 = vld [vmem:[%s1891_s5 + $0x1c0] sm:$0xff] }
  0xaf   : > { %1594 = vst.msk [vmem:[%s1902_s18 + $0x678] sm:$0xff] %vm217_vm0, %v2605_v20  ;;  %758 = vrot.lane.b32.xlu2 %v2227_v53, %s1825_s9 }
  0xb0   : > { %3387 = vst [vmem:[#allocation29_spill] sm:$0xff] %v2621_v28 }
  0xb1   : > { %1595 = vst.msk [vmem:[%s1902_s18 + $0x680] sm:$0xff] %vm217_vm0, %v2611_v24  ;;  %762 = vrot.lane.b32.xlu1 %v2239_v55, %s1825_s9 }
  0xb2   : > { %3388 = vst [vmem:[#allocation30_spill] sm:$0xff] %v2629_v21 }
  0xb3   : > { %1596 = vst.msk [vmem:[%s1902_s18 + $0x688] sm:$0xff] %vm217_vm0, %v2621_v28  ;;  %v2653_v28 = vld [vmem:[%s1891_s5 + $0x220] sm:$0xff]  ;;  %760 = vrot.lane.b32.xlu0 %v2233_v54, %s1825_s9 }
  0xb4   : > { %3389 = vst [vmem:[#allocation31_spill] sm:$0xff] %v2635_v27 }
  0xb5   : > { %1597 = vst.msk [vmem:[%s1902_s18 + $0x690] sm:$0xff] %vm217_vm0, %v2629_v21  ;;  %v2659_v21 = vld [vmem:[%s1891_s5 + $0x238] sm:$0xff] }
  0xb6   : > { %3390 = vst [vmem:[#allocation32_spill] sm:$0xff] %v2641_v31 }
  0xb7   : > { %1598 = vst.msk [vmem:[%s1902_s18 + $0x698] sm:$0xff] %vm217_vm0, %v2635_v27  ;;  %v2665_v27 = vld [vmem:[%s1891_s5 + $0x250] sm:$0xff]  ;;  %764 = vrot.lane.b32.xlu2 %v2245_v56, %s1825_s9 }
  0xb8   : > { %3391 = vst [vmem:[#allocation33_spill] sm:$0xff] %v2647_v26 }
  0xb9   : > { %1599 = vst.msk [vmem:[%s1902_s18 + $0x6a0] sm:$0xff] %vm217_vm0, %v2641_v31  ;;  %v2675_v31 = vld [vmem:[%s1891_s5 + $0x268] sm:$0xff]  ;;  %768 = vrot.lane.b32.xlu1 %v2263_v58, %s1825_s9 }
  0xba   : > { %3392 = vst [vmem:[#allocation34_spill] sm:$0xff] %v2653_v28 }
  0xbb   : > { %1600 = vst.msk [vmem:[%s1902_s18 + $0x6a8] sm:$0xff] %vm217_vm0, %v2647_v26  ;;  %v973_v26 = vld [vmem:[%s1891_s5 + $0x310] sm:$0xff]  ;;  %766 = vrot.lane.b32.xlu0 %v2255_v57, %s1825_s9 }
  0xbc   : > { %3393 = vst [vmem:[#allocation35_spill] sm:$0xff] %v2659_v21 }
  0xbd   : > { %1601 = vst.msk [vmem:[%s1902_s18 + $0x6b0] sm:$0xff] %vm217_vm0, %v2653_v28  ;;  %v2714_v28 = vld [vmem:[%s1891_s5 + $0x2f8] sm:$0xff] }
  0xbe   : > { %3394 = vst [vmem:[#allocation36_spill] sm:$0xff] %v2665_v27 }
  0xbf   : > { %1602 = vst.msk [vmem:[%s1902_s18 + $0x6b8] sm:$0xff] %vm217_vm0, %v2659_v21  ;;  %v2683_v21 = vld [vmem:[%s1891_s5 + $0x280] sm:$0xff]  ;;  %770 = vrot.lane.b32.xlu2 %v2269_v59, %s1825_s9 }
  0xc0   : > { %3395 = vst [vmem:[#allocation37_spill] sm:$0xff] %v2675_v31 }
  0xc1   : > { %1603 = vst.msk [vmem:[%s1902_s18 + $0x6c0] sm:$0xff] %vm217_vm0, %v2665_v27  ;;  %v2695_v27 = vld [vmem:[%s1891_s5 + $0x2b0] sm:$0xff]  ;;  %774 = vrot.lane.b32.xlu1 %v2281_v61, %s1825_s9 }
  0xc2   : > { %3396 = vst [vmem:[#allocation38_spill] sm:$0xff] %v2683_v21 }
  0xc3   : > { %1604 = vst.msk [vmem:[%s1902_s18 + $0x6c8] sm:$0xff] %vm217_vm0, %v2675_v31  ;;  %v2707_v31 = vld [vmem:[%s1891_s5 + $0x2e0] sm:$0xff]  ;;  %772 = vrot.lane.b32.xlu0 %v2275_v60, %s1825_s9 }
  0xc4   : > { %3397 = vst [vmem:[#allocation39_spill] sm:$0xff] %v2689_v30 }
  0xc5   : > { %1605 = vst.msk [vmem:[%s1902_s18 + $0x6d0] sm:$0xff] %vm217_vm0, %v2683_v21  ;;  %v367_v21 = vpop.permute.xlu1 %366 }
  0xc6   : > { %3398 = vst [vmem:[#allocation40_spill] sm:$0xff] %v2695_v27 }
  0xc7   : > { %1606 = vst.msk [vmem:[%s1902_s18 + $0x6d8] sm:$0xff] %vm217_vm0, %v2689_v30  ;;  %v976_v30 = vld [vmem:[%s1891_s5 + $0x358] sm:$0xff]  ;;  %776 = vrot.lane.b32.xlu2 %v2287_v62, %s1825_s9 }
  0xc8   : > { %3399 = vst [vmem:[#allocation41_spill] sm:$0xff] %v2701_v29 }
  0xc9   : > { %1607 = vst.msk [vmem:[%s1902_s18 + $0x6e0] sm:$0xff] %vm217_vm0, %v2695_v27  ;;  %v984_v27 = vld [vmem:[%s1891_s5 + $0x418] sm:$0xff]  ;;  %780 = vrot.lane.b32.xlu1 %v2299_v0, %s1825_s9 }
  0xca   : > { %3400 = vst [vmem:[#allocation42_spill] sm:$0xff] %v2707_v31 }
  0xcb   : > { %1608 = vst.msk [vmem:[%s1902_s18 + $0x6e8] sm:$0xff] %vm217_vm0, %v2701_v29  ;;  %v2727_v29 = vld [vmem:[%s1891_s5 + $0x328] sm:$0xff]  ;;  %778 = vrot.lane.b32.xlu0 %v2293_v63, %s1825_s9 }
  0xcc   : > { %3401 = vst [vmem:[#allocation43_spill] sm:$0xff] %v2714_v28 }
  0xcd   : > { %1609 = vst.msk [vmem:[%s1902_s18 + $0x6f0] sm:$0xff] %vm217_vm0, %v2707_v31  ;;  %v2735_v31 = vld [vmem:[%s1891_s5 + $0x340] sm:$0xff] }
  0xce   : > { %1610 = vst.msk [vmem:[%s1902_s18 + $0x6f8] sm:$0xff] %vm217_vm0, %v2714_v28  ;;  %v979_v28 = vld [vmem:[%s1891_s5 + $0x3a0] sm:$0xff] }
  0xcf   : > { %3402 = vst [vmem:[#allocation44_spill] sm:$0xff] %v2727_v29  ;;  %782 = vrot.lane.b32.xlu2 %v2305_v1, %s1825_s9 }
  0xd0   : > { %1611 = vst.msk [vmem:[%s1902_s18 + $0x700] sm:$0xff] %vm217_vm0, %v973_v26  ;;  %v2750_v26 = vld [vmem:[%s1891_s5 + $0x388] sm:$0xff] }
  0xd1   : > { %3403 = vst [vmem:[#allocation45_spill] sm:$0xff] %v2735_v31  ;;  %786 = vrot.lane.b32.xlu1 %v2317_v3, %s1825_s9  ;;  %v3408_v3 = vld [vmem:[#allocation6_spill] sm:$0xff] }
  0xd2   : > { %1612 = vst.msk [vmem:[%s1902_s18 + $0x708] sm:$0xff] %vm217_vm0, %v2727_v29  ;;  %v2762_v29 = vld [vmem:[%s1891_s5 + $0x3d0] sm:$0xff] }
  0xd3   : > { %1613 = vst.msk [vmem:[%s1902_s18 + $0x710] sm:$0xff] %vm217_vm0, %v2735_v31  ;;  %v982_v31 = vld [vmem:[%s1891_s5 + $0x3e8] sm:$0xff]  ;;  %784 = vrot.lane.b32.xlu0 %v2311_v2, %s1825_s9 }
  0xd4   : > { %3404 = vst [vmem:[#allocation46_spill] sm:$0xff] %v2744_v37 }
  0xd5   : > { %1614 = vst.msk [vmem:[%s1902_s18 + $0x718] sm:$0xff] %vm217_vm0, %v976_v30  ;;  %v983_v30 = vld [vmem:[%s1891_s5 + $0x400] sm:$0xff] }
  0xd6   : > { %3405 = vst [vmem:[#allocation47_spill] sm:$0xff] %v2750_v26 }
  0xd7   : > { %1615 = vst.msk [vmem:[%s1902_s18 + $0x720] sm:$0xff] %vm217_vm0, %v2744_v37  ;;  %v363_v37 = vpop.permute.xlu0 %362  ;;  %788 = vrot.lane.b32.xlu2 %v2323_v4, %s1825_s9  ;;  %v3409_v4 = vld [vmem:[#allocation5_spill] sm:$0xff] }
  0xd8   : > { %1616 = vst.msk [vmem:[%s1902_s18 + $0x728] sm:$0xff] %vm217_vm0, %v2750_v26  ;;  %v369_v26 = vpop.permute.xlu1 %368 }
  0xd9   : > { %3406 = vst [vmem:[#allocation48_spill] sm:$0xff] %v2759_v32  ;;  %792 = vrot.lane.b32.xlu1 %v2335_v6, %s1825_s9 }
  0xda   : > { %3407 = vst [vmem:[#allocation49_spill] sm:$0xff] %v2762_v29 }
  0xdb   : > { %1617 = vst.msk [vmem:[%s1902_s18 + $0x730] sm:$0xff] %vm217_vm0, %v979_v28  ;;  %v985_v28 = vld [vmem:[%s1891_s5 + $0x430] sm:$0xff]  ;;  %790 = vrot.lane.b32.xlu0 %v2329_v5, %s1825_s9 }
  0xdc   : > { %1618 = vst.msk [vmem:[%s1902_s18 + $0x738] sm:$0xff] %vm217_vm0, %v2759_v32  ;;  %v379_v32 = vpop.permute.xlu2 %378 }
  0xdd   : > { %1619 = vst.msk [vmem:[%s1902_s18 + $0x740] sm:$0xff] %vm217_vm0, %v2762_v29  ;;  %v988_v29 = vld [vmem:[%s1891_s5 + $0x478] sm:$0xff] }
  0xde   : > { %1620 = vst.msk [vmem:[%s1902_s18 + $0x748] sm:$0xff] %vm217_vm0, %v982_v31  ;;  %v3412_v31 = vld [vmem:[#allocation10_spill] sm:$0xff] }
  0xdf   : > { %1621 = vst.msk [vmem:[%s1902_s18 + $0x750] sm:$0xff] %vm217_vm0, %v983_v30  ;;  %v365_v35 = vpop.permute.xlu0 %364  ;;  %794 = vrot.lane.b32.xlu2 %v2341_v7, %s1825_s9 }
  0xe0   : > { %1622 = vst.msk [vmem:[%s1902_s18 + $0x758] sm:$0xff] %vm217_vm0, %v984_v27  ;;  %v377_v27 = vpop.permute.xlu1 %376 }
  0xe1   : > { %1623 = vst.msk [vmem:[%s1902_s18 + $0x760] sm:$0xff] %vm217_vm0, %v985_v28  ;;  %798 = vrot.lane.b32.xlu1 %v2353_v9, %s1825_s9  ;;  %v3411_v9 = vld [vmem:[#allocation7_spill] sm:$0xff] }
  0xe2   : > { %1624 = vst.msk [vmem:[%s1902_s18 + $0x768] sm:$0xff] %vm217_vm0, %v986_v36 }
  0xe3   : > { %1625 = vst.msk [vmem:[%s1902_s18 + $0x770] sm:$0xff] %vm217_vm0, %v987_v40  ;;  %796 = vrot.lane.b32.xlu0 %v2347_v8, %s1825_s9  ;;  %v3410_v8 = vld [vmem:[#allocation8_spill] sm:$0xff] }
  0xe4   : > { %1626 = vst.msk [vmem:[%s1902_s18 + $0x778] sm:$0xff] %vm217_vm0, %v988_v29  ;;  %v385_v39 = vpop.permute.xlu2 %384 }
  0xe5   : > { %1439 = vst.msk [vmem:[%s1902_s18 + $0x1a0] sm:$0xff] %vm217_vm0, %v371_v34 }
  0xe6   : > { %1437 = vst.msk [vmem:[%s1902_s18 + $0x190] sm:$0xff] %vm217_vm0, %v367_v21 }
  0xe7   : > { %1435 = vst.msk [vmem:[%s1902_s18 + $0x180] sm:$0xff] %vm217_vm0, %v363_v37  ;;  %v375_v38 = vpop.permute.xlu0 %374  ;;  %800 = vrot.lane.b32.xlu2 %v3409_v4, %s1825_s9  ;;  %v3414_v37 = vld [vmem:[#allocation12_spill] sm:$0xff]  ;;  %v3434_v4 = vld [vmem:[#allocation34_spill] sm:$0xff] }
  0xe8   : > { %1440 = vst.msk [vmem:[%s1902_s18 + $0x1a8] sm:$0xff] %vm217_vm0, %v373_v33  ;;  %v383_v43 = vpop.permute.xlu1 %382 }
  0xe9   : > { %1438 = vst.msk [vmem:[%s1902_s18 + $0x198] sm:$0xff] %vm217_vm0, %v369_v26  ;;  %804 = vrot.lane.b32.xlu1 %v2371_v12, %s1825_s9 }
  0xea   : > { %1436 = vst.msk [vmem:[%s1902_s18 + $0x188] sm:$0xff] %vm217_vm0, %v365_v35 }
  0xeb   : > { %1443 = vst.msk [vmem:[%s1902_s18 + $0x1c0] sm:$0xff] %vm217_vm0, %v379_v32  ;;  %802 = vrot.lane.b32.xlu0 %v3408_v3, %s1825_s9 }
  0xec   : > { %1442 = vst.msk [vmem:[%s1902_s18 + $0x1b8] sm:$0xff] %vm217_vm0, %v377_v27  ;;  %v391_v44 = vpop.permute.xlu2 %390 }
  0xed   : > { %1446 = vst.msk [vmem:[%s1902_s18 + $0x1d8] sm:$0xff] %vm217_vm0, %v385_v39 }
  0xee   : > { %1441 = vst.msk [vmem:[%s1902_s18 + $0x1b0] sm:$0xff] %vm217_vm0, %v375_v38  ;;  %v3419_v38 = vld [vmem:[#allocation17_spill] sm:$0xff] }
  0xef   : > { %1445 = vst.msk [vmem:[%s1902_s18 + $0x1d0] sm:$0xff] %vm217_vm0, %v383_v43  ;;  %v381_v41 = vpop.permute.xlu0 %380  ;;  %806 = vrot.lane.b32.xlu2 %v3411_v9, %s1825_s9  ;;  %v3436_v9 = vld [vmem:[#allocation33_spill] sm:$0xff] }
  0xf0   : > { %v389_v42 = vpop.permute.xlu1 %388  ;;  %1444 = vst.msk [vmem:[%s1902_s18 + $0x1c8] sm:$0xff] %vm217_vm0, %v381_v41 }
  0xf1   : > { %1448 = vst.msk [vmem:[%s1902_s18 + $0x1e8] sm:$0xff] %vm217_vm0, %v389_v42  ;;  %810 = vrot.lane.b32.xlu1 %v2389_v10, %s1825_s9 }
  0xf2   : > { %1449 = vst.msk [vmem:[%s1902_s18 + $0x1f0] sm:$0xff] %vm217_vm0, %v391_v44 }
  0xf3   : > { %808 = vrot.lane.b32.xlu0 %v3410_v8, %s1825_s9 }
  0xf4   : > { %v397_v47 = vpop.permute.xlu2 %396 }
  0xf5   : > { %1452 = vst.msk [vmem:[%s1902_s18 + $0x208] sm:$0xff] %vm217_vm0, %v397_v47 }
  0xf7   : > { %v387_v45 = vpop.permute.xlu0 %386 }
  0xf8   : > { %v395_v46 = vpop.permute.xlu1 %394  ;;  %1447 = vst.msk [vmem:[%s1902_s18 + $0x1e0] sm:$0xff] %vm217_vm0, %v387_v45  ;;  %v3421_v45 = vld [vmem:[#allocation19_spill] sm:$0xff] }
  0xf9   : > { %1451 = vst.msk [vmem:[%s1902_s18 + $0x200] sm:$0xff] %vm217_vm0, %v395_v46  ;;  %816 = vrot.lane.b32.xlu1 %v2413_v16, %s1825_s9  ;;  %v3413_v16 = vld [vmem:[#allocation9_spill] sm:$0xff] }
  0xfa   : > { %812 = vrot.lane.b32.xlu2 %v3413_v16, %s1825_s9 }
  0xfb   : > { %814 = vrot.lane.b32.xlu0 %v3412_v31, %s1825_s9 }
  0xfc   : > { %v403_v48 = vpop.permute.xlu2 %402 }
  0xfd   : > { %1455 = vst.msk [vmem:[%s1902_s18 + $0x220] sm:$0xff] %vm217_vm0, %v403_v48  ;;  %v3423_v48 = vld [vmem:[#allocation21_spill] sm:$0xff] }
  0xff   : > { %v393_v49 = vpop.permute.xlu0 %392 }
 0x100   : > { %v401_v50 = vpop.permute.xlu1 %400  ;;  %1450 = vst.msk [vmem:[%s1902_s18 + $0x1f8] sm:$0xff] %vm217_vm0, %v393_v49 }
 0x101   : > { %1454 = vst.msk [vmem:[%s1902_s18 + $0x218] sm:$0xff] %vm217_vm0, %v401_v50  ;;  %822 = vrot.lane.b32.xlu1 %v2431_v14, %s1825_s9  ;;  %v3415_v14 = vld [vmem:[#allocation11_spill] sm:$0xff] }
 0x102   : > { %818 = vrot.lane.b32.xlu2 %v3415_v14, %s1825_s9 }
 0x103   : > { %820 = vrot.lane.b32.xlu0 %v3414_v37, %s1825_s9 }
 0x104   : > { %v409_v51 = vpop.permute.xlu2 %408 }
 0x105   : > { %1458 = vst.msk [vmem:[%s1902_s18 + $0x238] sm:$0xff] %vm217_vm0, %v409_v51 }
 0x107   : > { %v399_v52 = vpop.permute.xlu0 %398 }
 0x108   : > { %v407_v53 = vpop.permute.xlu1 %406  ;;  %1453 = vst.msk [vmem:[%s1902_s18 + $0x210] sm:$0xff] %vm217_vm0, %v399_v52  ;;  %v3425_v52 = vld [vmem:[#allocation23_spill] sm:$0xff] }
 0x109   : > { %1457 = vst.msk [vmem:[%s1902_s18 + $0x230] sm:$0xff] %vm217_vm0, %v407_v53  ;;  %828 = vrot.lane.b32.xlu1 %v2449_v15, %s1825_s9  ;;  %v3416_v15 = vld [vmem:[#allocation13_spill] sm:$0xff] }
 0x10a   : > { %824 = vrot.lane.b32.xlu2 %v3416_v15, %s1825_s9  ;;  %v3444_v15 = vld [vmem:[#allocation38_spill] sm:$0xff] }
 0x10b   : > { %826 = vrot.lane.b32.xlu0 %v2443_v13, %s1825_s9  ;;  %v3417_v13 = vld [vmem:[#allocation15_spill] sm:$0xff] }
 0x10c   : > { %v415_v54 = vpop.permute.xlu2 %414 }
 0x10d   : > { %1461 = vst.msk [vmem:[%s1902_s18 + $0x250] sm:$0xff] %vm217_vm0, %v415_v54 }
 0x10f   : > { %v405_v55 = vpop.permute.xlu0 %404 }
 0x110   : > { %v413_v56 = vpop.permute.xlu1 %412  ;;  %1456 = vst.msk [vmem:[%s1902_s18 + $0x228] sm:$0xff] %vm217_vm0, %v405_v55 }
 0x111   : > { %1460 = vst.msk [vmem:[%s1902_s18 + $0x248] sm:$0xff] %vm217_vm0, %v413_v56  ;;  %834 = vrot.lane.b32.xlu1 %v2473_v18, %s1825_s9  ;;  %v3418_v18 = vld [vmem:[#allocation14_spill] sm:$0xff]  ;;  %v3427_v56 = vld [vmem:[#allocation25_spill] sm:$0xff] }
 0x112   : > { %830 = vrot.lane.b32.xlu2 %v3418_v18, %s1825_s9  ;;  %v3446_v18 = vld [vmem:[#allocation45_spill] sm:$0xff] }
 0x113   : > { %832 = vrot.lane.b32.xlu0 %v3417_v13, %s1825_s9  ;;  %v3445_v13 = vld [vmem:[#allocation42_spill] sm:$0xff] }
 0x114   : > { %v421_v57 = vpop.permute.xlu2 %420 }
 0x115   : > { %1464 = vst.msk [vmem:[%s1902_s18 + $0x268] sm:$0xff] %vm217_vm0, %v421_v57 }
 0x117   : > { %v411_v58 = vpop.permute.xlu0 %410 }
 0x118   : > { %v419_v59 = vpop.permute.xlu1 %418  ;;  %1459 = vst.msk [vmem:[%s1902_s18 + $0x240] sm:$0xff] %vm217_vm0, %v411_v58 }
 0x119   : > { %1463 = vst.msk [vmem:[%s1902_s18 + $0x260] sm:$0xff] %vm217_vm0, %v419_v59  ;;  %840 = vrot.lane.b32.xlu1 %v2491_v19, %s1825_s9  ;;  %v3420_v19 = vld [vmem:[#allocation16_spill] sm:$0xff] }
 0x11a   : > { %836 = vrot.lane.b32.xlu2 %v3420_v19, %s1825_s9  ;;  %v1070_v19 = vld [vmem:[%s1891_s5 + $0x310] sm:$0xff] }
 0x11b   : > { %838 = vrot.lane.b32.xlu0 %v3419_v38, %s1825_s9 }
 0x11c   : > { %v427_v60 = vpop.permute.xlu2 %426 }
 0x11d   : > { %1467 = vst.msk [vmem:[%s1902_s18 + $0x280] sm:$0xff] %vm217_vm0, %v427_v60  ;;  %v3429_v60 = vld [vmem:[#allocation27_spill] sm:$0xff] }
 0x11f   : > { %v417_v61 = vpop.permute.xlu0 %416 }
 0x120   : > { %v425_v62 = vpop.permute.xlu1 %424  ;;  %1462 = vst.msk [vmem:[%s1902_s18 + $0x258] sm:$0xff] %vm217_vm0, %v417_v61 }
 0x121   : > { %1466 = vst.msk [vmem:[%s1902_s18 + $0x278] sm:$0xff] %vm217_vm0, %v425_v62  ;;  %1136 = vrot.lane.b32.xlu1 %v2513_v17, %s1825_s9  ;;  %v3422_v17 = vld [vmem:[#allocation18_spill] sm:$0xff] }
 0x122   : > { %842 = vrot.lane.b32.xlu2 %v3422_v17, %s1825_s9 }
 0x123   : > { %1134 = vrot.lane.b32.xlu0 %v3421_v45, %s1825_s9 }
 0x124   : > { %v433_v63 = vpop.permute.xlu2 %432 }
 0x125   : > { %1470 = vst.msk [vmem:[%s1902_s18 + $0x298] sm:$0xff] %vm217_vm0, %v433_v63 }
 0x127   : > { %v423_v0 = vpop.permute.xlu0 %422 }
 0x128   : > { %v431_v1 = vpop.permute.xlu1 %430  ;;  %1465 = vst.msk [vmem:[%s1902_s18 + $0x270] sm:$0xff] %vm217_vm0, %v423_v0  ;;  %v3431_v0 = vld [vmem:[#allocation31_spill] sm:$0xff] }
 0x129   : > { %1469 = vst.msk [vmem:[%s1902_s18 + $0x290] sm:$0xff] %vm217_vm0, %v431_v1  ;;  %1142 = vrot.lane.b32.xlu1 %v2533_v25, %s1825_s9  ;;  %v3424_v25 = vld [vmem:[#allocation20_spill] sm:$0xff] }
 0x12a   : > { %1138 = vrot.lane.b32.xlu2 %v3424_v25, %s1825_s9 }
 0x12b   : > { %1140 = vrot.lane.b32.xlu0 %v3423_v48, %s1825_s9 }
 0x12c   : > { %v439_v2 = vpop.permute.xlu2 %438 }
 0x12d   : > { %1473 = vst.msk [vmem:[%s1902_s18 + $0x2b0] sm:$0xff] %vm217_vm0, %v439_v2 }
 0x12f   : > { %v429_v5 = vpop.permute.xlu0 %428 }
 0x130   : > { %v437_v6 = vpop.permute.xlu1 %436  ;;  %1468 = vst.msk [vmem:[%s1902_s18 + $0x288] sm:$0xff] %vm217_vm0, %v429_v5  ;;  %v3435_v5 = vld [vmem:[#allocation29_spill] sm:$0xff] }
 0x131   : > { %1472 = vst.msk [vmem:[%s1902_s18 + $0x2a8] sm:$0xff] %vm217_vm0, %v437_v6  ;;  %1148 = vrot.lane.b32.xlu1 %v2551_v11, %s1825_s9  ;;  %v3426_v11 = vld [vmem:[#allocation22_spill] sm:$0xff] }
 0x132   : > { %1144 = vrot.lane.b32.xlu2 %v3426_v11, %s1825_s9 }
 0x133   : > { %1146 = vrot.lane.b32.xlu0 %v3425_v52, %s1825_s9  ;;  %v3452_v52 = vld [vmem:[#allocation48_spill] sm:$0xff] }
 0x134   : > { %v445_v7 = vpop.permute.xlu2 %444 }
 0x135   : > { %1476 = vst.msk [vmem:[%s1902_s18 + $0x2c8] sm:$0xff] %vm217_vm0, %v445_v7 }
 0x137   : > { %v435_v10 = vpop.permute.xlu0 %434 }
 0x138   : > { %v443_v12 = vpop.permute.xlu1 %442  ;;  %1471 = vst.msk [vmem:[%s1902_s18 + $0x2a0] sm:$0xff] %vm217_vm0, %v435_v10  ;;  %v3437_v10 = vld [vmem:[#allocation37_spill] sm:$0xff] }
 0x139   : > { %1475 = vst.msk [vmem:[%s1902_s18 + $0x2c0] sm:$0xff] %vm217_vm0, %v443_v12  ;;  %1154 = vrot.lane.b32.xlu1 %v2575_v22, %s1825_s9  ;;  %v3428_v22 = vld [vmem:[#allocation24_spill] sm:$0xff] }
 0x13a   : > { %1150 = vrot.lane.b32.xlu2 %v3428_v22, %s1825_s9  ;;  %v3438_v12 = vld [vmem:[#allocation32_spill] sm:$0xff]  ;;  %v1079_v22 = vld [vmem:[%s1891_s5 + $0x3e8] sm:$0xff] }
 0x13b   : > { %1152 = vrot.lane.b32.xlu0 %v3427_v56, %s1825_s9  ;;  %v1084_v56 = vld [vmem:[%s1891_s5 + $0x460] sm:$0xff] }
 0x13c   : > { %v451_v21 = vpop.permute.xlu2 %450 }
 0x13d   : > { %1479 = vst.msk [vmem:[%s1902_s18 + $0x2e0] sm:$0xff] %vm217_vm0, %v451_v21 }
 0x13f   : > { %v441_v34 = vpop.permute.xlu0 %440 }
 0x140   : > { %v449_v29 = vpop.permute.xlu1 %448  ;;  %1474 = vst.msk [vmem:[%s1902_s18 + $0x2b8] sm:$0xff] %vm217_vm0, %v441_v34  ;;  %v3439_v34 = vld [vmem:[#allocation36_spill] sm:$0xff] }
 0x141   : > { %1478 = vst.msk [vmem:[%s1902_s18 + $0x2d8] sm:$0xff] %vm217_vm0, %v449_v29  ;;  %1160 = vrot.lane.b32.xlu1 %v2593_v23, %s1825_s9  ;;  %v3430_v23 = vld [vmem:[#allocation26_spill] sm:$0xff]  ;;  %v3440_v29 = vld [vmem:[#allocation40_spill] sm:$0xff] }
 0x142   : > { %1156 = vrot.lane.b32.xlu2 %v3430_v23, %s1825_s9  ;;  %v1082_v23 = vld [vmem:[%s1891_s5 + $0x430] sm:$0xff] }
 0x143   : > { %1158 = vrot.lane.b32.xlu0 %v3429_v60, %s1825_s9  ;;  %v1083_v60 = vld [vmem:[%s1891_s5 + $0x448] sm:$0xff] }
 0x144   : > { %v457_v33 = vpop.permute.xlu2 %456 }
 0x145   : > { %1482 = vst.msk [vmem:[%s1902_s18 + $0x2f8] sm:$0xff] %vm217_vm0, %v457_v33  ;;  %v3441_v33 = vld [vmem:[#allocation35_spill] sm:$0xff] }
 0x147   : > { %v447_v26 = vpop.permute.xlu0 %446 }
 0x148   : > { %v455_v32 = vpop.permute.xlu1 %454  ;;  %1477 = vst.msk [vmem:[%s1902_s18 + $0x2d0] sm:$0xff] %vm217_vm0, %v447_v26 }
 0x149   : > { %1481 = vst.msk [vmem:[%s1902_s18 + $0x2f0] sm:$0xff] %vm217_vm0, %v455_v32  ;;  %1166 = vrot.lane.b32.xlu1 %v2611_v24, %s1825_s9  ;;  %v3432_v24 = vld [vmem:[#allocation28_spill] sm:$0xff]  ;;  %v3442_v32 = vld [vmem:[#allocation39_spill] sm:$0xff] }
 0x14a   : > { %1162 = vrot.lane.b32.xlu2 %v3432_v24, %s1825_s9 }
 0x14b   : > { %1164 = vrot.lane.b32.xlu0 %v2605_v20, %s1825_s9  ;;  %v3433_v20 = vld [vmem:[#allocation30_spill] sm:$0xff] }
 0x14c   : > { %v753_v30 = vpop.permute.xlu2 %752 }
 0x14d   : > { %1533 = vst.msk [vmem:[%s1902_s18 + $0x490] sm:$0xff] %vm217_vm0, %v753_v30  ;;  %v3443_v30 = vld [vmem:[#allocation43_spill] sm:$0xff] }
 0x14f   : > { %v453_v28 = vpop.permute.xlu0 %452 }
 0x150   : > { %v751_v36 = vpop.permute.xlu1 %750  ;;  %1480 = vst.msk [vmem:[%s1902_s18 + $0x2e8] sm:$0xff] %vm217_vm0, %v453_v28 }
 0x151   : > { %1532 = vst.msk [vmem:[%s1902_s18 + $0x488] sm:$0xff] %vm217_vm0, %v751_v36  ;;  %1172 = vrot.lane.b32.xlu1 %v3431_v0, %s1825_s9  ;;  %v1085_v0 = vld [vmem:[%s1891_s5 + $0x478] sm:$0xff] }
 0x152   : > { %1168 = vrot.lane.b32.xlu2 %v3435_v5, %s1825_s9 }
 0x153   : > { %1170 = vrot.lane.b32.xlu0 %v3433_v20, %s1825_s9 }
 0x154   : > { %v759_v40 = vpop.permute.xlu2 %758 }
 0x155   : > { %1536 = vst.msk [vmem:[%s1902_s18 + $0x4a8] sm:$0xff] %vm217_vm0, %v759_v40 }
 0x157   : > { %v749_v35 = vpop.permute.xlu0 %748 }
 0x158   : > { %v757_v27 = vpop.permute.xlu1 %756  ;;  %1531 = vst.msk [vmem:[%s1902_s18 + $0x480] sm:$0xff] %vm217_vm0, %v749_v35  ;;  %v3447_v35 = vld [vmem:[#allocation41_spill] sm:$0xff] }
 0x159   : > { %1535 = vst.msk [vmem:[%s1902_s18 + $0x4a0] sm:$0xff] %vm217_vm0, %v757_v27  ;;  %1178 = vrot.lane.b32.xlu1 %v3434_v4, %s1825_s9 }
 0x15a   : > { %1174 = vrot.lane.b32.xlu2 %v3438_v12, %s1825_s9 }
 0x15b   : > { %1176 = vrot.lane.b32.xlu0 %v3436_v9, %s1825_s9 }
 0x15c   : > { %v765_v39 = vpop.permute.xlu2 %764 }
 0x15d   : > { %1539 = vst.msk [vmem:[%s1902_s18 + $0x4c0] sm:$0xff] %vm217_vm0, %v765_v39 }
 0x15f   : > { %v755_v43 = vpop.permute.xlu0 %754 }
 0x160   : > { %v763_v41 = vpop.permute.xlu1 %762  ;;  %1534 = vst.msk [vmem:[%s1902_s18 + $0x498] sm:$0xff] %vm217_vm0, %v755_v43  ;;  %v3448_v43 = vld [vmem:[#allocation44_spill] sm:$0xff] }
 0x161   : > { %1538 = vst.msk [vmem:[%s1902_s18 + $0x4b8] sm:$0xff] %vm217_vm0, %v763_v41  ;;  %1184 = vrot.lane.b32.xlu1 %v3437_v10, %s1825_s9  ;;  %v3449_v41 = vld [vmem:[#allocation47_spill] sm:$0xff] }
 0x162   : > { %1180 = vrot.lane.b32.xlu2 %v3441_v33, %s1825_s9 }
 0x163   : > { %1182 = vrot.lane.b32.xlu0 %v3439_v34, %s1825_s9 }
 0x164   : > { %v771_v42 = vpop.permute.xlu2 %770 }
 0x165   : > { %1542 = vst.msk [vmem:[%s1902_s18 + $0x4d8] sm:$0xff] %vm217_vm0, %v771_v42 }
 0x167   : > { %v761_v46 = vpop.permute.xlu0 %760 }
 0x168   : > { %v769_v44 = vpop.permute.xlu1 %768  ;;  %1537 = vst.msk [vmem:[%s1902_s18 + $0x4b0] sm:$0xff] %vm217_vm0, %v761_v46  ;;  %v1073_v46 = vld [vmem:[%s1891_s5 + $0x358] sm:$0xff] }
 0x169   : > { %1541 = vst.msk [vmem:[%s1902_s18 + $0x4d0] sm:$0xff] %vm217_vm0, %v769_v44  ;;  %1190 = vrot.lane.b32.xlu1 %v3440_v29, %s1825_s9  ;;  %v3450_v44 = vld [vmem:[#allocation46_spill] sm:$0xff] }
 0x16a   : > { %1186 = vrot.lane.b32.xlu2 %v3444_v15, %s1825_s9 }
 0x16b   : > { %1188 = vrot.lane.b32.xlu0 %v3442_v32, %s1825_s9 }
 0x16c   : > { %v777_v47 = vpop.permute.xlu2 %776 }
 0x16d   : > { %1545 = vst.msk [vmem:[%s1902_s18 + $0x4f0] sm:$0xff] %vm217_vm0, %v777_v47  ;;  %v3451_v47 = vld [vmem:[#allocation49_spill] sm:$0xff] }
 0x16f   : > { %v767_v49 = vpop.permute.xlu0 %766 }
 0x170   : > { %v775_v50 = vpop.permute.xlu1 %774  ;;  %1540 = vst.msk [vmem:[%s1902_s18 + $0x4c8] sm:$0xff] %vm217_vm0, %v767_v49 }
 0x171   : > { %1544 = vst.msk [vmem:[%s1902_s18 + $0x4e8] sm:$0xff] %vm217_vm0, %v775_v50  ;;  %1196 = vrot.lane.b32.xlu1 %v3443_v30, %s1825_s9  ;;  %v1081_v50 = vld [vmem:[%s1891_s5 + $0x418] sm:$0xff] }
 0x172   : > { %1192 = vrot.lane.b32.xlu2 %v3447_v35, %s1825_s9 }
 0x173   : > { %1194 = vrot.lane.b32.xlu0 %v3445_v13, %s1825_s9 }
 0x174   : > { %v783_v51 = vpop.permute.xlu2 %782 }
 0x175   : > { %1548 = vst.msk [vmem:[%s1902_s18 + $0x508] sm:$0xff] %vm217_vm0, %v783_v51  ;;  %v1076_v51 = vld [vmem:[%s1891_s5 + $0x3a0] sm:$0xff] }
 0x177   : > { %v773_v53 = vpop.permute.xlu0 %772 }
 0x178   : > { %v781_v54 = vpop.permute.xlu1 %780  ;;  %1543 = vst.msk [vmem:[%s1902_s18 + $0x4e0] sm:$0xff] %vm217_vm0, %v773_v53 }
 0x179   : > { %1547 = vst.msk [vmem:[%s1902_s18 + $0x500] sm:$0xff] %vm217_vm0, %v781_v54  ;;  %1202 = vrot.lane.b32.xlu1 %v3446_v18, %s1825_s9 }
 0x17a   : > { %1198 = vrot.lane.b32.xlu2 %v1070_v19, %s1825_s9 }
 0x17b   : > { %1200 = vrot.lane.b32.xlu0 %v3448_v43, %s1825_s9 }
 0x17c   : > { %v789_v55 = vpop.permute.xlu2 %788 }
 0x17d   : > { %1551 = vst.msk [vmem:[%s1902_s18 + $0x520] sm:$0xff] %vm217_vm0, %v789_v55  ;;  %v1080_v55 = vld [vmem:[%s1891_s5 + $0x400] sm:$0xff] }
 0x17f   : > { %v779_v57 = vpop.permute.xlu0 %778 }
 0x180   : > { %v787_v58 = vpop.permute.xlu1 %786  ;;  %1546 = vst.msk [vmem:[%s1902_s18 + $0x4f8] sm:$0xff] %vm217_vm0, %v779_v57 }
 0x181   : > { %1550 = vst.msk [vmem:[%s1902_s18 + $0x518] sm:$0xff] %vm217_vm0, %v787_v58  ;;  %1208 = vrot.lane.b32.xlu1 %v3449_v41, %s1825_s9 }
 0x182   : > { %1204 = vrot.lane.b32.xlu2 %v1073_v46, %s1825_s9 }
 0x183   : > { %1206 = vrot.lane.b32.xlu0 %v3450_v44, %s1825_s9 }
 0x184   : > { %v795_v59 = vpop.permute.xlu2 %794 }
 0x185   : > { %1554 = vst.msk [vmem:[%s1902_s18 + $0x538] sm:$0xff] %vm217_vm0, %v795_v59 }
 0x187   : > { %v785_v61 = vpop.permute.xlu0 %784 }
 0x188   : > { %v793_v62 = vpop.permute.xlu1 %792  ;;  %1549 = vst.msk [vmem:[%s1902_s18 + $0x510] sm:$0xff] %vm217_vm0, %v785_v61 }
 0x189   : > { %1553 = vst.msk [vmem:[%s1902_s18 + $0x530] sm:$0xff] %vm217_vm0, %v793_v62  ;;  %1214 = vrot.lane.b32.xlu1 %v3451_v47, %s1825_s9 }
 0x18a   : > { %1210 = vrot.lane.b32.xlu2 %v1076_v51, %s1825_s9 }
 0x18b   : > { %1212 = vrot.lane.b32.xlu0 %v3452_v52, %s1825_s9 }
 0x18c   : > { %v801_v63 = vpop.permute.xlu2 %800 }
 0x18d   : > { %1557 = vst.msk [vmem:[%s1902_s18 + $0x550] sm:$0xff] %vm217_vm0, %v801_v63 }
 0x18f   : > { %v791_v1 = vpop.permute.xlu0 %790 }
 0x190   : > { %v799_v2 = vpop.permute.xlu1 %798  ;;  %1552 = vst.msk [vmem:[%s1902_s18 + $0x528] sm:$0xff] %vm217_vm0, %v791_v1 }
 0x191   : > { %1556 = vst.msk [vmem:[%s1902_s18 + $0x548] sm:$0xff] %vm217_vm0, %v799_v2  ;;  %1220 = vrot.lane.b32.xlu1 %v1081_v50, %s1825_s9 }
 0x192   : > { %1216 = vrot.lane.b32.xlu2 %v1079_v22, %s1825_s9 }
 0x193   : > { %1218 = vrot.lane.b32.xlu0 %v1080_v55, %s1825_s9 }
 0x194   : > { %v807_v3 = vpop.permute.xlu2 %806 }
 0x195   : > { %1560 = vst.msk [vmem:[%s1902_s18 + $0x568] sm:$0xff] %vm217_vm0, %v807_v3 }
 0x197   : > { %v797_v6 = vpop.permute.xlu0 %796 }
 0x198   : > { %v805_v7 = vpop.permute.xlu1 %804  ;;  %1555 = vst.msk [vmem:[%s1902_s18 + $0x540] sm:$0xff] %vm217_vm0, %v797_v6 }
 0x199   : > { %1559 = vst.msk [vmem:[%s1902_s18 + $0x560] sm:$0xff] %vm217_vm0, %v805_v7  ;;  %1226 = vrot.lane.b32.xlu1 %v1084_v56, %s1825_s9 }
 0x19a   : > { %1222 = vrot.lane.b32.xlu2 %v1082_v23, %s1825_s9 }
 0x19b   : > { %1224 = vrot.lane.b32.xlu0 %v1083_v60, %s1825_s9 }
 0x19c   : > { %v813_v8 = vpop.permute.xlu2 %812 }
 0x19d   : > { %1563 = vst.msk [vmem:[%s1902_s18 + $0x580] sm:$0xff] %vm217_vm0, %v813_v8 }
 0x19f   : > { %v803_v21 = vpop.permute.xlu0 %802 }
 0x1a0   : > { %v811_v31 = vpop.permute.xlu1 %810  ;;  %1558 = vst.msk [vmem:[%s1902_s18 + $0x558] sm:$0xff] %vm217_vm0, %v803_v21 }
 0x1a1   : > { %1562 = vst.msk [vmem:[%s1902_s18 + $0x578] sm:$0xff] %vm217_vm0, %v811_v31 }
 0x1a2   : > { %1228 = vrot.lane.b32.xlu2 %v1085_v0, %s1825_s9 }
 0x1a4   : > { %v819_v16 = vpop.permute.xlu2 %818 }
 0x1a5   : > { %1566 = vst.msk [vmem:[%s1902_s18 + $0x598] sm:$0xff] %vm217_vm0, %v819_v16 }
 0x1a7   : > { %v809_v37 = vpop.permute.xlu0 %808 }
 0x1a8   : > { %v817_v14 = vpop.permute.xlu1 %816  ;;  %1561 = vst.msk [vmem:[%s1902_s18 + $0x570] sm:$0xff] %vm217_vm0, %v809_v37 }
 0x1a9   : > { %1565 = vst.msk [vmem:[%s1902_s18 + $0x590] sm:$0xff] %vm217_vm0, %v817_v14 }
 0x1ac   : > { %v825_v26 = vpop.permute.xlu2 %824 }
 0x1ad   : > { %1569 = vst.msk [vmem:[%s1902_s18 + $0x5b0] sm:$0xff] %vm217_vm0, %v825_v26 }
 0x1af   : > { %v815_v28 = vpop.permute.xlu0 %814 }
 0x1b0   : > { %v823_v36 = vpop.permute.xlu1 %822  ;;  %1564 = vst.msk [vmem:[%s1902_s18 + $0x588] sm:$0xff] %vm217_vm0, %v815_v28 }
 0x1b1   : > { %1568 = vst.msk [vmem:[%s1902_s18 + $0x5a8] sm:$0xff] %vm217_vm0, %v823_v36 }
 0x1b4   : > { %v831_v40 = vpop.permute.xlu2 %830 }
 0x1b5   : > { %1572 = vst.msk [vmem:[%s1902_s18 + $0x5c8] sm:$0xff] %vm217_vm0, %v831_v40 }
 0x1b7   : > { %v821_v27 = vpop.permute.xlu0 %820 }
 0x1b8   : > { %v829_v39 = vpop.permute.xlu1 %828  ;;  %1567 = vst.msk [vmem:[%s1902_s18 + $0x5a0] sm:$0xff] %vm217_vm0, %v821_v27 }
 0x1b9   : > { %1571 = vst.msk [vmem:[%s1902_s18 + $0x5c0] sm:$0xff] %vm217_vm0, %v829_v39 }
 0x1bc   : > { %v837_v38 = vpop.permute.xlu2 %836 }
 0x1bd   : > { %1575 = vst.msk [vmem:[%s1902_s18 + $0x5e0] sm:$0xff] %vm217_vm0, %v837_v38 }
 0x1bf   : > { %v827_v42 = vpop.permute.xlu0 %826 }
 0x1c0   : > { %v835_v45 = vpop.permute.xlu1 %834  ;;  %1570 = vst.msk [vmem:[%s1902_s18 + $0x5b8] sm:$0xff] %vm217_vm0, %v827_v42 }
 0x1c1   : > { %1574 = vst.msk [vmem:[%s1902_s18 + $0x5d8] sm:$0xff] %vm217_vm0, %v835_v45 }
 0x1c4   : > { %v843_v17 = vpop.permute.xlu2 %842 }
 0x1c5   : > { %1578 = vst.msk [vmem:[%s1902_s18 + $0x5f8] sm:$0xff] %vm217_vm0, %v843_v17 }
 0x1c7   : > { %v833_v48 = vpop.permute.xlu0 %832 }
 0x1c8   : > { %v841_v25 = vpop.permute.xlu1 %840  ;;  %1573 = vst.msk [vmem:[%s1902_s18 + $0x5d0] sm:$0xff] %vm217_vm0, %v833_v48 }
 0x1c9   : > { %1577 = vst.msk [vmem:[%s1902_s18 + $0x5f0] sm:$0xff] %vm217_vm0, %v841_v25 }
 0x1cc   : > { %v1139_v49 = vpop.permute.xlu2 %1138 }
 0x1cd   : > { %1629 = vst.msk [vmem:[%s1902_s18 + $0x790] sm:$0xff] %vm217_vm0, %v1139_v49 }
 0x1cf   : > { %v839_v11 = vpop.permute.xlu0 %838 }
 0x1d0   : > { %v1137_v53 = vpop.permute.xlu1 %1136  ;;  %1576 = vst.msk [vmem:[%s1902_s18 + $0x5e8] sm:$0xff] %vm217_vm0, %v839_v11 }
 0x1d1   : > { %1628 = vst.msk [vmem:[%s1902_s18 + $0x788] sm:$0xff] %vm217_vm0, %v1137_v53 }
 0x1d4   : > { %v1145_v54 = vpop.permute.xlu2 %1144 }
 0x1d5   : > { %1632 = vst.msk [vmem:[%s1902_s18 + $0x7a8] sm:$0xff] %vm217_vm0, %v1145_v54 }
 0x1d7   : > { %v1135_v57 = vpop.permute.xlu0 %1134 }
 0x1d8   : > { %v1143_v58 = vpop.permute.xlu1 %1142  ;;  %1627 = vst.msk [vmem:[%s1902_s18 + $0x780] sm:$0xff] %vm217_vm0, %v1135_v57 }
 0x1d9   : > { %1631 = vst.msk [vmem:[%s1902_s18 + $0x7a0] sm:$0xff] %vm217_vm0, %v1143_v58 }
 0x1dc   : > { %v1151_v59 = vpop.permute.xlu2 %1150 }
 0x1dd   : > { %1635 = vst.msk [vmem:[%s1902_s18 + $0x7c0] sm:$0xff] %vm217_vm0, %v1151_v59 }
 0x1df   : > { %v1141_v61 = vpop.permute.xlu0 %1140 }
 0x1e0   : > { %v1149_v62 = vpop.permute.xlu1 %1148  ;;  %1630 = vst.msk [vmem:[%s1902_s18 + $0x798] sm:$0xff] %vm217_vm0, %v1141_v61 }
 0x1e1   : > { %1634 = vst.msk [vmem:[%s1902_s18 + $0x7b8] sm:$0xff] %vm217_vm0, %v1149_v62 }
 0x1e4   : > { %v1157_v63 = vpop.permute.xlu2 %1156 }
 0x1e5   : > { %1638 = vst.msk [vmem:[%s1902_s18 + $0x7d8] sm:$0xff] %vm217_vm0, %v1157_v63 }
 0x1e7   : > { %v1147_v24 = vpop.permute.xlu0 %1146 }
 0x1e8   : > { %v1155_v1 = vpop.permute.xlu1 %1154  ;;  %1633 = vst.msk [vmem:[%s1902_s18 + $0x7b0] sm:$0xff] %vm217_vm0, %v1147_v24 }
 0x1e9   : > { %1637 = vst.msk [vmem:[%s1902_s18 + $0x7d0] sm:$0xff] %vm217_vm0, %v1155_v1 }
 0x1ec   : > { %v1163_v2 = vpop.permute.xlu2 %1162 }
 0x1ed   : > { %1641 = vst.msk [vmem:[%s1902_s18 + $0x7f0] sm:$0xff] %vm217_vm0, %v1163_v2 }
 0x1ef   : > { %v1153_v3 = vpop.permute.xlu0 %1152 }
 0x1f0   : > { %v1161_v20 = vpop.permute.xlu1 %1160  ;;  %1636 = vst.msk [vmem:[%s1902_s18 + $0x7c8] sm:$0xff] %vm217_vm0, %v1153_v3 }
 0x1f1   : > { %1640 = vst.msk [vmem:[%s1902_s18 + $0x7e8] sm:$0xff] %vm217_vm0, %v1161_v20 }
 0x1f4   : > { %v1169_v4 = vpop.permute.xlu2 %1168 }
 0x1f5   : > { %1644 = vst.msk [vmem:[%s1902_s18 + $0x808] sm:$0xff] %vm217_vm0, %v1169_v4 }
 0x1f7   : > { %v1159_v5 = vpop.permute.xlu0 %1158 }
 0x1f8   : > { %v1167_v6 = vpop.permute.xlu1 %1166  ;;  %1639 = vst.msk [vmem:[%s1902_s18 + $0x7e0] sm:$0xff] %vm217_vm0, %v1159_v5 }
 0x1f9   : > { %1643 = vst.msk [vmem:[%s1902_s18 + $0x800] sm:$0xff] %vm217_vm0, %v1167_v6 }
 0x1fc   : > { %v1175_v7 = vpop.permute.xlu2 %1174 }
 0x1fd   : > { %1647 = vst.msk [vmem:[%s1902_s18 + $0x820] sm:$0xff] %vm217_vm0, %v1175_v7 }
 0x1ff   : > { %v1165_v8 = vpop.permute.xlu0 %1164 }
 0x200   : > { %v1173_v9 = vpop.permute.xlu1 %1172  ;;  %1642 = vst.msk [vmem:[%s1902_s18 + $0x7f8] sm:$0xff] %vm217_vm0, %v1165_v8 }
 0x201   : > { %1646 = vst.msk [vmem:[%s1902_s18 + $0x818] sm:$0xff] %vm217_vm0, %v1173_v9 }
 0x204   : > { %v1181_v10 = vpop.permute.xlu2 %1180 }
 0x205   : > { %1650 = vst.msk [vmem:[%s1902_s18 + $0x838] sm:$0xff] %vm217_vm0, %v1181_v10 }
 0x207   : > { %v1171_v12 = vpop.permute.xlu0 %1170 }
 0x208   : > { %v1179_v21 = vpop.permute.xlu1 %1178  ;;  %1645 = vst.msk [vmem:[%s1902_s18 + $0x810] sm:$0xff] %vm217_vm0, %v1171_v12 }
 0x209   : > { %1649 = vst.msk [vmem:[%s1902_s18 + $0x830] sm:$0xff] %vm217_vm0, %v1179_v21 }
 0x20c   : > { %v1187_v31 = vpop.permute.xlu2 %1186 }
 0x20d   : > { %1653 = vst.msk [vmem:[%s1902_s18 + $0x850] sm:$0xff] %vm217_vm0, %v1187_v31 }
 0x20f   : > { %v1177_v16 = vpop.permute.xlu0 %1176 }
 0x210   : > { %v1185_v34 = vpop.permute.xlu1 %1184  ;;  %1648 = vst.msk [vmem:[%s1902_s18 + $0x828] sm:$0xff] %vm217_vm0, %v1177_v16 }
 0x211   : > { %1652 = vst.msk [vmem:[%s1902_s18 + $0x848] sm:$0xff] %vm217_vm0, %v1185_v34 }
 0x214   : > { %v1193_v29 = vpop.permute.xlu2 %1192 }
 0x215   : > { %1656 = vst.msk [vmem:[%s1902_s18 + $0x868] sm:$0xff] %vm217_vm0, %v1193_v29 }
 0x217   : > { %v1183_v33 = vpop.permute.xlu0 %1182 }
 0x218   : > { %v1191_v37 = vpop.permute.xlu1 %1190  ;;  %1651 = vst.msk [vmem:[%s1902_s18 + $0x840] sm:$0xff] %vm217_vm0, %v1183_v33 }
 0x219   : > { %1655 = vst.msk [vmem:[%s1902_s18 + $0x860] sm:$0xff] %vm217_vm0, %v1191_v37 }
 0x21c   : > { %v1199_v14 = vpop.permute.xlu2 %1198 }
 0x21d   : > { %1659 = vst.msk [vmem:[%s1902_s18 + $0x880] sm:$0xff] %vm217_vm0, %v1199_v14 }
 0x21f   : > { %v1189_v26 = vpop.permute.xlu0 %1188 }
 0x220   : > { %v1197_v32 = vpop.permute.xlu1 %1196  ;;  %1654 = vst.msk [vmem:[%s1902_s18 + $0x858] sm:$0xff] %vm217_vm0, %v1189_v26 }
 0x221   : > { %1658 = vst.msk [vmem:[%s1902_s18 + $0x878] sm:$0xff] %vm217_vm0, %v1197_v32 }
 0x224   : > { %v1205_v30 = vpop.permute.xlu2 %1204 }
 0x225   : > { %1662 = vst.msk [vmem:[%s1902_s18 + $0x898] sm:$0xff] %vm217_vm0, %v1205_v30 }
 0x227   : > { %v1195_v15 = vpop.permute.xlu0 %1194 }
 0x228   : > { %v1203_v28 = vpop.permute.xlu1 %1202  ;;  %1657 = vst.msk [vmem:[%s1902_s18 + $0x870] sm:$0xff] %vm217_vm0, %v1195_v15 }
 0x229   : > { %1661 = vst.msk [vmem:[%s1902_s18 + $0x890] sm:$0xff] %vm217_vm0, %v1203_v28 }
 0x22c   : > { %v1211_v36 = vpop.permute.xlu2 %1210 }
 0x22d   : > { %1665 = vst.msk [vmem:[%s1902_s18 + $0x8b0] sm:$0xff] %vm217_vm0, %v1211_v36 }
 0x22f   : > { %v1201_v40 = vpop.permute.xlu0 %1200 }
 0x230   : > { %v1209_v13 = vpop.permute.xlu1 %1208  ;;  %1660 = vst.msk [vmem:[%s1902_s18 + $0x888] sm:$0xff] %vm217_vm0, %v1201_v40 }
 0x231   : > { %1664 = vst.msk [vmem:[%s1902_s18 + $0x8a8] sm:$0xff] %vm217_vm0, %v1209_v13 }
 0x234   : > { %v1217_v18 = vpop.permute.xlu2 %1216 }
 0x235   : > { %1668 = vst.msk [vmem:[%s1902_s18 + $0x8c8] sm:$0xff] %vm217_vm0, %v1217_v18 }
 0x237   : > { %v1207_v35 = vpop.permute.xlu0 %1206 }
 0x238   : > { %v1215_v27 = vpop.permute.xlu1 %1214  ;;  %1663 = vst.msk [vmem:[%s1902_s18 + $0x8a0] sm:$0xff] %vm217_vm0, %v1207_v35 }
 0x239   : > { %1667 = vst.msk [vmem:[%s1902_s18 + $0x8c0] sm:$0xff] %vm217_vm0, %v1215_v27 }
 0x23c   : > { %v1223_v39 = vpop.permute.xlu2 %1222 }
 0x23d   : > { %1671 = vst.msk [vmem:[%s1902_s18 + $0x8e0] sm:$0xff] %vm217_vm0, %v1223_v39 }
 0x23f   : > { %v1213_v38 = vpop.permute.xlu0 %1212 }
 0x240   : > { %v1221_v19 = vpop.permute.xlu1 %1220  ;;  %1666 = vst.msk [vmem:[%s1902_s18 + $0x8b8] sm:$0xff] %vm217_vm0, %v1213_v38 }
 0x241   : > { %1670 = vst.msk [vmem:[%s1902_s18 + $0x8d8] sm:$0xff] %vm217_vm0, %v1221_v19 }
 0x244   : > { %v1229_v43 = vpop.permute.xlu2 %1228 }
 0x245   : > { %1674 = vst.msk [vmem:[%s1902_s18 + $0x8f8] sm:$0xff] %vm217_vm0, %v1229_v43 }
 0x247   : > { %v1219_v41 = vpop.permute.xlu0 %1218 }
 0x248   : > { %v1227_v42 = vpop.permute.xlu1 %1226  ;;  %1669 = vst.msk [vmem:[%s1902_s18 + $0x8d0] sm:$0xff] %vm217_vm0, %v1219_v41 }
 0x249   : > { %1673 = vst.msk [vmem:[%s1902_s18 + $0x8f0] sm:$0xff] %vm217_vm0, %v1227_v42 }
 0x24f   : > { %v1225_v45 = vpop.permute.xlu0 %1224 }
 0x250   : > { %1672 = vst.msk [vmem:[%s1902_s18 + $0x8e8] sm:$0xff] %vm217_vm0, %v1225_v45 }
 0x251 PF: > { %s14_s11 = sadd.s32 1, %s1820_s11   ;;  %s3453_s6 = smov %s1804_s7 }
 0x252   : > { %p11_p0 = scmp.ge.s32.totalorder %s14_s11, 4   ;;  %s3454_s7 = smov %s1808_s8 }
 0x253   : > { %s3455_s8 = smov %s1881_s17  ;;  %s3456_s9 = smov %s1816_s10 }
 0x254   : > { %s3457_s10 = smov %s3459_s13  ;;  %13 = sbr.rel (!%p11_p0) target bundleno = 4 (0x4), region = 69 }
 0x259   :  { %1359 = vsyncpa [#allocation3], 1 }
 0x25a   :  { %1361 = vsyncpa [#allocation3 + $0x1], 1 }

</bundles_post_ra>
